<compile_context>
chip_gen: v7x
topology: tpu7x:2x2x1
jax: 0.10.0
libtpu: 0.0.40
codegen_flags: <defaults>
</compile_context>

<pallas_src>
import math
import jax
import jax.numpy as jnp
from jax.experimental import pallas as pl
from jax.experimental.pallas import tpu as pltpu

LANE = 128


# ----------------------------- helpers -----------------------------

def _round_up(v, m):
    return ((v + m - 1) // m) * m


def _pick_tile(n_pad, cap):
    """Largest tile in {2048,...,128} that divides n_pad and is <= cap."""
    for t in (2048, 1024, 512, 256, 128):
        if t <= cap and n_pad % t == 0:
            return t
    return 128


def _pad2(a, rows, cols, fill=0.0):
    out = jnp.full((rows, cols), fill, a.dtype)
    return out.at[:a.shape[0], :a.shape[1]].set(a)


def _vmem_limit(est_bytes):
    """Scoped-VMEM request: 2x the estimated working set, floored at 32 MiB and
    capped at 3/4 of physical VMEM (64 MiB fallback if the query is unavailable)."""
    try:
        cap = pltpu.get_tpu_info().vmem_capacity_bytes
    except Exception:
        cap = 64 * 1024 * 1024
    return int(min(cap * 3 // 4, max(32 * 1024 * 1024, 2 * est_bytes)))


# ----------------------------- Pallas kernels -----------------------------

def _sage1_kernel(a_ref, xk_ref, xi_ref, wl_ref, wr_ref, b_ref, o_ref, acc_ref):
    # SAGEConv (mean aggr): out = relu( (A_norm@X) @ W_l + X @ W_r + b )
    # grid = (row tiles, neighbor-reduction tiles); acc_ref is the A@X f32 accumulator.
    k = pl.program_id(1)

    @pl.when(k == 0)
    def _():
        acc_ref[...] = jnp.zeros_like(acc_ref)

    acc_ref[...] += jnp.dot(a_ref[...], xk_ref[...],
                            preferred_element_type=jnp.float32)

    @pl.when(k == pl.num_programs(1) - 1)
    def _():
        h = jnp.dot(acc_ref[...].astype(jnp.bfloat16), wl_ref[...],
                    preferred_element_type=jnp.float32)
        h = h + jnp.dot(xi_ref[...], wr_ref[...],
                        preferred_element_type=jnp.float32)
        h = h + b_ref[...]
        o_ref[...] = jnp.maximum(h, 0.0).astype(o_ref.dtype)


def sage_conv1(a_norm, x_pad, w_l, w_r, b, *, tm, tk, vmem_limit):
    npad, fpad = x_pad.shape
    hpad = w_l.shape[1]
    grid = (npad // tm, npad // tk)
    return pl.pallas_call(
        _sage1_kernel,
        out_shape=jax.ShapeDtypeStruct((npad, hpad), jnp.bfloat16),
        grid_spec=pltpu.PrefetchScalarGridSpec(
            num_scalar_prefetch=0,
            grid=grid,
            in_specs=[
                pl.BlockSpec((tm, tk), lambda i, k: (i, k)),      # adjacency tile (bf16)
                pl.BlockSpec((tk, fpad), lambda i, k: (k, 0)),    # neighbor features
                pl.BlockSpec((tm, fpad), lambda i, k: (i, 0)),    # root features
                pl.BlockSpec(w_l.shape, lambda i, k: (0, 0)),
                pl.BlockSpec(w_r.shape, lambda i, k: (0, 0)),
                pl.BlockSpec(b.shape, lambda i, k: (0, 0)),
            ],
            out_specs=pl.BlockSpec((tm, hpad), lambda i, k: (i, 0)),
            scratch_shapes=[pltpu.VMEM((tm, fpad), jnp.float32)],
        ),
        compiler_params=pltpu.CompilerParams(
            dimension_semantics=("parallel", "arbitrary"),
            vmem_limit_bytes=vmem_limit,
        ),
    )(a_norm, x_pad, x_pad, w_l, w_r, b)


def _gram_kernel(xi_ref, xjt_ref, o_ref):
    # S[i, j] = <x1[i], x1[j]> with a pre-transposed second operand (no in-kernel xpose)
    o_ref[...] = jnp.dot(xi_ref[...], xjt_ref[...],
                         preferred_element_type=jnp.float32)


def gram(x_bf16, xt_bf16, *, tm):
    npad, hpad = x_bf16.shape
    grid = (npad // tm, npad // tm)
    return pl.pallas_call(
        _gram_kernel,
        out_shape=jax.ShapeDtypeStruct((npad, npad), jnp.float32),
        grid_spec=pltpu.PrefetchScalarGridSpec(
            num_scalar_prefetch=0,
            grid=grid,
            in_specs=[pl.BlockSpec((tm, hpad), lambda i, j: (i, 0)),
                      pl.BlockSpec((hpad, tm), lambda i, j: (0, j))],
            out_specs=pl.BlockSpec((tm, tm), lambda i, j: (i, j)),
        ),
        compiler_params=pltpu.CompilerParams(
            dimension_semantics=("parallel", "parallel")),
    )(x_bf16, xt_bf16)


def _wsage_layers_kernel(a_ref, x1_ref, wl_ref, wr_ref, b_ref, o_ref,
                         acc_ref, ha_ref, hb_ref):
    # All WeightedSAGE layers fused into one kernel.
    # grid = (layer, row tiles, neighbor-reduction tiles); the running node features
    # ping-pong between the bf16 ha/hb VMEM buffers (no HBM round trip per layer).
    l = pl.program_id(0)
    i = pl.program_id(1)
    k = pl.program_id(2)
    nk = pl.num_programs(2)
    tm, hpad = acc_ref.shape
    tk = a_ref.shape[1]
    parity = l % 2  # even layers read ha, write hb; odd layers the reverse

    # one-time seed: layer-0 input features (conv1 output) -> ping buffer
    @pl.when(jnp.logical_and(l == 0, jnp.logical_and(i == 0, k == 0)))
    def _():
        ha_ref[...] = x1_ref[...]

    @pl.when(k == 0)
    def _():
        acc_ref[...] = jnp.zeros_like(acc_ref)

    # ---- aggregate: acc += Aw_norm[rows i, cols k] @ h_prev[cols k] (bf16 direct) ----
    koff = pl.multiple_of(k * tk, tk)

    @pl.when(parity == 0)
    def _():
        acc_ref[...] += jnp.dot(a_ref[...], ha_ref[pl.ds(koff, tk), :],
                                preferred_element_type=jnp.float32)

    @pl.when(parity == 1)
    def _():
        acc_ref[...] += jnp.dot(a_ref[...], hb_ref[pl.ds(koff, tk), :],
                                preferred_element_type=jnp.float32)

    # ---- epilogue: agg@W_l + root@W_r + b, relu, ping-pong h, emit (last layer wins) ----
    @pl.when(k == nk - 1)
    def _():
        roff = pl.multiple_of(i * tm, tm)
        agg = jnp.dot(acc_ref[...].astype(jnp.bfloat16), wl_ref[0],
                      preferred_element_type=jnp.float32)

        @pl.when(parity == 0)
        def _():
            root = ha_ref[pl.ds(roff, tm), :]
            h_new = jnp.maximum(
                agg + jnp.dot(root, wr_ref[0], preferred_element_type=jnp.float32)
                + b_ref[0], 0.0).astype(jnp.bfloat16)
            hb_ref[pl.ds(roff, tm), :] = h_new
            o_ref[...] = h_new

        @pl.when(parity == 1)
        def _():
            root = hb_ref[pl.ds(roff, tm), :]
            h_new = jnp.maximum(
                agg + jnp.dot(root, wr_ref[0], preferred_element_type=jnp.float32)
                + b_ref[0], 0.0).astype(jnp.bfloat16)
            ha_ref[pl.ds(roff, tm), :] = h_new
            o_ref[...] = h_new


def wsage_layers(aw_norm, x1_bf16, wl_stack, wr_stack, b_stack, *, tm, tk, vmem_limit):
    num_layers = wl_stack.shape[0]
    npad, hpad = x1_bf16.shape
    grid = (num_layers, npad // tm, npad // tk)
    return pl.pallas_call(
        _wsage_layers_kernel,
        out_shape=jax.ShapeDtypeStruct((npad, hpad), jnp.bfloat16),
        grid_spec=pltpu.PrefetchScalarGridSpec(
            num_scalar_prefetch=0,
            grid=grid,
            in_specs=[
                pl.BlockSpec((tm, tk), lambda l, i, k: (i, k)),            # weighted adjacency
                pl.BlockSpec((npad, hpad), lambda l, i, k: (0, 0)),        # x1 (DMA'd once)
                pl.BlockSpec((1, hpad, hpad), lambda l, i, k: (l, 0, 0)),  # W_l per layer
                pl.BlockSpec((1, hpad, hpad), lambda l, i, k: (l, 0, 0)),  # W_r per layer
                pl.BlockSpec((1, 1, hpad), lambda l, i, k: (l, 0, 0)),     # bias per layer
            ],
            out_specs=pl.BlockSpec((tm, hpad), lambda l, i, k: (i, 0)),
            scratch_shapes=[
                pltpu.VMEM((tm, hpad), jnp.float32),     # A@h accumulator
                pltpu.VMEM((npad, hpad), jnp.bfloat16),  # h ping buffer
                pltpu.VMEM((npad, hpad), jnp.bfloat16),  # h pong buffer
            ],
        ),
        compiler_params=pltpu.CompilerParams(
            # all axes sequential: the ping-pong buffers carry state across both the
            # layer axis and the node-row axis.
            dimension_semantics=("arbitrary", "arbitrary", "arbitrary"),
            vmem_limit_bytes=vmem_limit,
        ),
    )(aw_norm, x1_bf16, wl_stack, wr_stack, b_stack)


def _head_kernel(m_ref, h_ref, w1_ref, b1_ref, w2_ref, b2_ref, o_ref, acc_ref):
    # global_mean_pool (reduction over node tiles) -> relu(lin1) -> (dropout = identity
    # in eval) -> lin2 -> log_softmax.  Padded class columns carry bias -1e30 so they
    # never affect max / logsumexp.
    k = pl.program_id(0)

    @pl.when(k == 0)
    def _():
        acc_ref[...] = jnp.zeros_like(acc_ref)

    acc_ref[...] += jnp.dot(m_ref[...], h_ref[...],
                            preferred_element_type=jnp.float32)

    @pl.when(k == pl.num_programs(0) - 1)
    def _():
        pooled = acc_ref[...]
        h1 = jnp.maximum(
            jnp.dot(pooled.astype(jnp.bfloat16), w1_ref[...],
                    preferred_element_type=jnp.float32) + b1_ref[...], 0.0)
        logits = jnp.dot(h1.astype(jnp.bfloat16), w2_ref[...],
                         preferred_element_type=jnp.float32) + b2_ref[...]
        z = logits - jnp.max(logits, axis=-1, keepdims=True)
        o_ref[...] = z - jnp.log(jnp.sum(jnp.exp(z), axis=-1, keepdims=True))


def head_fn(pool_mat, h_bf16, w1, b1, w2, b2, *, tk):
    g = pool_mat.shape[0]
    npad, hpad = h_bf16.shape
    cpad = w2.shape[1]
    grid = (npad // tk,)
    return pl.pallas_call(
        _head_kernel,
        out_shape=jax.ShapeDtypeStruct((g, cpad), jnp.float32),
        grid_spec=pltpu.PrefetchScalarGridSpec(
            num_scalar_prefetch=0,
            grid=grid,
            in_specs=[
                pl.BlockSpec((g, tk), lambda k: (0, k)),
                pl.BlockSpec((tk, hpad), lambda k: (k, 0)),
                pl.BlockSpec(w1.shape, lambda k: (0, 0)),
                pl.BlockSpec(b1.shape, lambda k: (0, 0)),
                pl.BlockSpec(w2.shape, lambda k: (0, 0)),
                pl.BlockSpec(b2.shape, lambda k: (0, 0)),
            ],
            out_specs=pl.BlockSpec((g, cpad), lambda k: (0, 0)),
            scratch_shapes=[pltpu.VMEM((g, hpad), jnp.float32)],
        ),
        compiler_params=pltpu.CompilerParams(dimension_semantics=("arbitrary",)),
    )(pool_mat, h_bf16, w1, b1, w2, b2)


# ----------------------------- JAX glue -----------------------------

def topk_sample(scores, src, dst, batch_src, mask, num_graphs, num_nodes, ratio):
    """Deterministic per-graph top-k over masked (src<dst) edges, symmetrized to both
    directions.  Sort-based O(E log E) ranking.  Returns a {0,1} float vector (E,)."""
    # TODO(synk): IMLE / Gumbel-noise perturbation (GraphIMLETopK) and the 'connected'
    # variant are not reproduced; this is the deterministic eval-path top-k.
    e = scores.shape[0]
    idx = jnp.arange(e, dtype=jnp.int32)

    # sort by (graph asc, unmasked-last, score desc, edge idx asc)
    order = jnp.lexsort((idx, -scores, (~mask).astype(jnp.int32), batch_src))

    counts_all = jax.ops.segment_sum(jnp.ones((e,), jnp.int32), batch_src, num_graphs)
    seg_start = jnp.concatenate(
        [jnp.zeros((1,), jnp.int32), jnp.cumsum(counts_all)[:-1]])
    pos_sorted = idx - seg_start[batch_src[order]]
    rank = jnp.zeros((e,), jnp.int32).at[order].set(pos_sorted)

    m_g = jax.ops.segment_sum(mask.astype(jnp.float32), batch_src, num_graphs)
    k_g = jnp.ceil(ratio * m_g)
    selected = (mask & (rank.astype(jnp.float32) < k_g[batch_src])).astype(jnp.float32)

    # symmetrize via an (N, N) selection matrix (consistent with the dense adjacency)
    sel_mat = jnp.zeros((num_nodes, num_nodes), jnp.float32).at[src, dst].max(selected)
    sel_mat = jnp.maximum(sel_mat, sel_mat.T)
    return sel_mat[src, dst]


def l2x_gsg_forward(params, x, edge_index, batch, num_graphs, ratio, train_phase=False):
    src, dst = edge_index[0], edge_index[1]
    n, fdim = x.shape
    hidden = params["conv1_wl"].shape[1]
    out_dim = params["lin2_w"].shape[1]

    npad = _round_up(n, LANE)
    fpad = _round_up(fdim, LANE)
    hpad = _round_up(hidden, LANE)
    cpad = _round_up(out_dim, LANE)

    tm = _pick_tile(npad, 512)    # row tile (sublane axis)
    tk = _pick_tile(npad, 2048)   # neighbor-reduction tile (lane axis of adjacency)

    # rough working-set estimates for scoped-VMEM requests (double-buffered inputs)
    conv1_est = (2 * tm * tk * 2 + 2 * tk * fpad * 2 + 2 * tm * fpad * 2
                 + 4 * fpad * hpad * 2 + 2 * tm * hpad * 2 + tm * fpad * 4)
    wsage_est = (2 * tm * tk * 2 + 2 * npad * hpad * 2 + 4 * hpad * hpad * 2
                 + 2 * tm * hpad * 2 + tm * hpad * 4 + 2 * npad * hpad * 2)

    # zero-padded node features (rows/cols of padded nodes are zero everywhere)
    x_pad = jnp.zeros((npad, fpad), jnp.float32).at[:n, :fdim].set(x).astype(jnp.bfloat16)

    # unweighted mean-aggregation adjacency (messages flow src -> dst), bf16 for the MXU
    A = jnp.zeros((npad, npad), jnp.float32).at[dst, src].add(1.0)
    deg_in = jnp.maximum(jnp.sum(A, axis=1, keepdims=True), 1.0)
    A_norm = (A / deg_in).astype(jnp.bfloat16)

    # x = relu(conv1(x, edge_index))  -- lane-padded weights, bf16 output
    wl1 = _pad2(params["conv1_wl"], fpad, hpad).astype(jnp.bfloat16)
    wr1 = _pad2(params["conv1_wr"], fpad, hpad).astype(jnp.bfloat16)
    b1c = _pad2(params["conv1_b"], 1, hpad)
    x1 = sage_conv1(A_norm, x_pad, wl1, wr1, b1c, tm=tm, tk=tk,
                    vmem_limit=_vmem_limit(conv1_est))          # (npad, hpad) bf16

    # edge_scores = sum(x1[src] * x1[dst]) via the lane-dense Gram matrix on the MXU
    x1t = x1.T                                                  # one wrapper-side transpose
    S = gram(x1, x1t, tm=tm)                                    # f32 scores (top-k precision)
    scores = S[src, dst]

    mask = src < dst
    batch_src = batch[src]
    sections = jax.ops.segment_sum(
        jnp.ones_like(src, dtype=jnp.int32), batch_src, num_graphs)

    sampled_edges = topk_sample(scores, src, dst, batch_src, mask, num_graphs, n, ratio)
    edge_weights = scores * sampled_edges

    # TODO(synk): WeightedSAGEConv source not provided; interpreted as SAGEConv with
    # edge-weighted messages normalized by the unweighted in-degree.
    Aw = jnp.zeros((npad, npad), jnp.float32).at[dst, src].add(edge_weights)
    Aw_norm = (Aw / deg_in).astype(jnp.bfloat16)

    if len(params["convs"]) > 0:
        wl_stack = jnp.stack(
            [_pad2(wl, hpad, hpad) for (wl, _, _) in params["convs"]]).astype(jnp.bfloat16)
        wr_stack = jnp.stack(
            [_pad2(wr, hpad, hpad) for (_, wr, _) in params["convs"]]).astype(jnp.bfloat16)
        b_stack = jnp.stack([_pad2(b, 1, hpad) for (_, _, b) in params["convs"]])
        h = wsage_layers(Aw_norm, x1, wl_stack, wr_stack, b_stack, tm=tm, tk=tk,
                         vmem_limit=_vmem_limit(wsage_est))     # (npad, hpad) bf16
    else:
        h = x1

    # global mean pool as a (G, Npad) matrix (padded columns masked out)
    batch_pad = jnp.full((npad,), num_graphs, jnp.int32).at[:n].set(batch)
    counts = jax.ops.segment_sum(jnp.ones((n,), jnp.float32), batch, num_graphs)
    pool_mat = (batch_pad[None, :] == jnp.arange(num_graphs)[:, None]).astype(jnp.float32)
    pool_mat = (pool_mat / jnp.maximum(counts, 1.0)[:, None]).astype(jnp.bfloat16)

    w1p = _pad2(params["lin1_w"], hpad, hpad).astype(jnp.bfloat16)
    b1p = _pad2(params["lin1_b"], 1, hpad)
    w2p = _pad2(params["lin2_w"], hpad, cpad).astype(jnp.bfloat16)
    # padded class logits get bias -1e30 so they vanish in max / logsumexp
    b2p = jnp.full((1, cpad), -1e30, jnp.float32).at[:, :out_dim].set(params["lin2_b"])

    # TODO(synk): dropout(p=0.5) is identity in eval (train_phase=False path only).
    log_probs = head_fn(pool_mat, h, w1p, b1p, w2p, b2p, tk=tk)[:, :out_dim]
    return log_probs, sampled_edges, sections


def init_params(key, input_dim, hidden, output_dim, num_layers):
    def glorot(k, fan_in, fan_out):
        s = math.sqrt(6.0 / (fan_in + fan_out))
        return jax.random.uniform(k, (fan_in, fan_out), jnp.float32, -s, s)

    keys = jax.random.split(key, 8 + 2 * (num_layers - 1))
    p = {
        "conv1_wl": glorot(keys[0], input_dim, hidden),
        "conv1_wr": glorot(keys[1], input_dim, hidden),
        "conv1_b": jnp.zeros((1, hidden), jnp.float32),
        "lin1_w": glorot(keys[2], hidden, hidden),
        "lin1_b": 0.01 * jax.random.normal(keys[3], (1, hidden), jnp.float32),
        "lin2_w": glorot(keys[4], hidden, output_dim),
        "lin2_b": 0.01 * jax.random.normal(keys[5], (1, output_dim), jnp.float32),
        "convs": [],
    }
    for i in range(num_layers - 1):
        kl, kr = keys[6 + 2 * i], keys[7 + 2 * i]
        p["convs"].append((glorot(kl, hidden, hidden),
                           glorot(kr, hidden, hidden),
                           jnp.zeros((1, hidden), jnp.float32)))
    return p


def make_graph(num_graphs=2, nodes_per_graph=8):
    und = [(0, 1), (1, 2), (2, 3), (3, 4), (4, 5), (5, 6), (6, 7), (7, 0), (0, 4), (2, 6)]
    src, dst = [], []
    for g in range(num_graphs):
        o = g * nodes_per_graph
        for (u, v) in und:
            src += [u + o, v + o]
            dst += [v + o, u + o]
    edge_index = jnp.array([src, dst], dtype=jnp.int32)
    batch = jnp.repeat(jnp.arange(num_graphs, dtype=jnp.int32), nodes_per_graph)
    return edge_index, batch


if __name__ == "__main__":
    NUM_GRAPHS = 2
    NODES_PER_GRAPH = 8
    INPUT_DIM = 8
    HIDDEN = 32
    OUTPUT_DIM = 4
    NUM_LAYERS = 3
    RATIO = 0.5

    key = jax.random.PRNGKey(0)
    k_x, k_p = jax.random.split(key)

    edge_index, batch = make_graph(NUM_GRAPHS, NODES_PER_GRAPH)
    n_nodes = NUM_GRAPHS * NODES_PER_GRAPH
    x = jax.random.normal(k_x, (n_nodes, INPUT_DIM), jnp.float32)
    params = init_params(k_p, INPUT_DIM, HIDDEN, OUTPUT_DIM, NUM_LAYERS)

    forward = jax.jit(l2x_gsg_forward, static_argnums=(4, 5, 6))
    log_probs, sampled_edges, sections = forward(
        params, x, edge_index, batch, NUM_GRAPHS, RATIO, False)

    jax.block_until_ready((log_probs, sampled_edges, sections))
    assert log_probs.shape == (NUM_GRAPHS, OUTPUT_DIM)
    assert sampled_edges.shape == (edge_index.shape[1],)
    assert sections.shape == (NUM_GRAPHS,)
    assert bool(jnp.all(jnp.isfinite(log_probs)))
    print("KERNEL_OK")
</pallas_src>

<mosaic_0001>
module attributes {stable_mosaic.version = 11 : i64} {
  func.func private @main(%arg0: i32) attributes {dimension_semantics = [#tpu.dimension_semantics<core_parallel>], iteration_bounds = array<i64: 2>, tpu.core_type = #tpu.core_type<sc_scalar_subcore>, window_params = []} {
    return
  }
}

module attributes {stable_mosaic.version = 11 : i64} {
  func.func private @main(%arg0: i32) attributes {dimension_semantics = [#tpu.dimension_semantics<core_parallel>], iteration_bounds = array<i64: 2>, tpu.core_type = #tpu.core_type<sc_scalar_subcore>, window_params = []} {
    return
  }
}

module attributes {stable_mosaic.version = 11 : i64} {
  func.func @_sage1_kernel(%arg0: i32, %arg1: i32, %arg2: memref<128x128xbf16, #tpu.memory_space<vmem>>, %arg3: memref<128x128xbf16, #tpu.memory_space<vmem>>, %arg4: memref<128x128xbf16, #tpu.memory_space<vmem>>, %arg5: memref<128x128xbf16, #tpu.memory_space<vmem>>, %arg6: memref<128x128xbf16, #tpu.memory_space<vmem>>, %arg7: memref<1x128xf32, #tpu.memory_space<vmem>>, %arg8: memref<128x128xbf16, #tpu.memory_space<vmem>>, %arg9: memref<128x128xf32, #tpu.memory_space<vmem>>) attributes {dimension_semantics = [#tpu.dimension_semantics<parallel>, #tpu.dimension_semantics<arbitrary>], iteration_bounds = array<i64: 1, 1>, scalar_prefetch = 0 : i64, scratch_operands = 1 : i64, tpu.core_type = #tpu.core_type<tc>, window_params = [{transform_indices = @transform_0, window_bounds = array<i64: 128, 128>}, {transform_indices = @transform_1, window_bounds = array<i64: 128, 128>}, {transform_indices = @transform_2, window_bounds = array<i64: 128, 128>}, {pipeline_mode = #tpu.pipeline_mode<synchronous>, transform_indices = @transform_3, window_bounds = array<i64: 128, 128>}, {pipeline_mode = #tpu.pipeline_mode<synchronous>, transform_indices = @transform_4, window_bounds = array<i64: 128, 128>}, {pipeline_mode = #tpu.pipeline_mode<synchronous>, transform_indices = @transform_5, window_bounds = array<i64: 1, 128>}, {transform_indices = @transform_6, window_bounds = array<i64: 128, 128>}]} {
    %c0_i32 = arith.constant 0 : i32
    %0 = arith.cmpi eq, %arg1, %c0_i32 : i32
    %1 = arith.extui %0 : i1 to i32
    %c0_i32_0 = arith.constant 0 : i32
    %2 = arith.cmpi ne, %1, %c0_i32_0 : i32
    scf.if %2 {
      %cst_10 = arith.constant 0.000000e+00 : f32
      %12 = vector.broadcast %cst_10 : f32 to vector<128x128xf32>
      %c0_11 = arith.constant 0 : index
      %c0_12 = arith.constant 0 : index
      %13 = vector.load %arg9[%c0_11, %c0_12] : memref<128x128xf32, #tpu.memory_space<vmem>>, vector<128x128xf32>
      tpu.vector_store %arg9[%c0_11, %c0_12], %12 {strides = array<i32>} : memref<128x128xf32, #tpu.memory_space<vmem>>, vector<128x128xf32>,
    } else {
    }
    %c0 = arith.constant 0 : index
    %c0_1 = arith.constant 0 : index
    %3 = vector.load %arg9[%c0, %c0_1] : memref<128x128xf32, #tpu.memory_space<vmem>>, vector<128x128xf32>
    %c0_2 = arith.constant 0 : index
    %c0_3 = arith.constant 0 : index
    %4 = vector.load %arg2[%c0_2, %c0_3] : memref<128x128xbf16, #tpu.memory_space<vmem>>, vector<128x128xbf16>
    %c0_4 = arith.constant 0 : index
    %c0_5 = arith.constant 0 : index
    %5 = vector.load %arg3[%c0_4, %c0_5] : memref<128x128xbf16, #tpu.memory_space<vmem>>, vector<128x128xbf16>
    %cst = arith.constant dense<0.000000e+00> : vector<128x128xf32>
    %6 = tpu.matmul %4, %5, %cst {dimension_numbers = #tpu.dot_dimension_numbers<[1], [0], [0], [1], [0, 0, 1, 1], [], []>} : vector<128x128xbf16>, vector<128x128xbf16>, vector<128x128xf32> -> vector<128x128xf32>
    %7 = arith.addf %3, %6 : vector<128x128xf32>
    %c0_6 = arith.constant 0 : index
    %c0_7 = arith.constant 0 : index
    %8 = vector.load %arg9[%c0_6, %c0_7] : memref<128x128xf32, #tpu.memory_space<vmem>>, vector<128x128xf32>
    tpu.vector_store %arg9[%c0_6, %c0_7], %7 {strides = array<i32>} : memref<128x128xf32, #tpu.memory_space<vmem>>, vector<128x128xf32>,
    %c0_i32_8 = arith.constant 0 : i32
    %9 = arith.cmpi eq, %arg1, %c0_i32_8 : i32
    %10 = arith.extui %9 : i1 to i32
    %c0_i32_9 = arith.constant 0 : i32
    %11 = arith.cmpi ne, %10, %c0_i32_9 : i32
    scf.if %11 {
      %c0_10 = arith.constant 0 : index
      %c0_11 = arith.constant 0 : index
      %12 = vector.load %arg9[%c0_10, %c0_11] : memref<128x128xf32, #tpu.memory_space<vmem>>, vector<128x128xf32>
      %13 = arith.truncf %12 : vector<128x128xf32> to vector<128x128xbf16>
      %c0_12 = arith.constant 0 : index
      %c0_13 = arith.constant 0 : index
      %14 = vector.load %arg5[%c0_12, %c0_13] : memref<128x128xbf16, #tpu.memory_space<vmem>>, vector<128x128xbf16>
      %cst_14 = arith.constant dense<0.000000e+00> : vector<128x128xf32>
      %15 = tpu.matmul %13, %14, %cst_14 {dimension_numbers = #tpu.dot_dimension_numbers<[1], [0], [0], [1], [0, 0, 1, 1], [], []>} : vector<128x128xbf16>, vector<128x128xbf16>, vector<128x128xf32> -> vector<128x128xf32>
      %c0_15 = arith.constant 0 : index
      %c0_16 = arith.constant 0 : index
      %16 = vector.load %arg4[%c0_15, %c0_16] : memref<128x128xbf16, #tpu.memory_space<vmem>>, vector<128x128xbf16>
      %c0_17 = arith.constant 0 : index
      %c0_18 = arith.constant 0 : index
      %17 = vector.load %arg6[%c0_17, %c0_18] : memref<128x128xbf16, #tpu.memory_space<vmem>>, vector<128x128xbf16>
      %cst_19 = arith.constant dense<0.000000e+00> : vector<128x128xf32>
      %18 = tpu.matmul %16, %17, %cst_19 {dimension_numbers = #tpu.dot_dimension_numbers<[1], [0], [0], [1], [0, 0, 1, 1], [], []>} : vector<128x128xbf16>, vector<128x128xbf16>, vector<128x128xf32> -> vector<128x128xf32>
      %19 = arith.addf %15, %18 : vector<128x128xf32>
      %c0_20 = arith.constant 0 : index
      %c0_21 = arith.constant 0 : index
      %20 = vector.load %arg7[%c0_20, %c0_21] : memref<1x128xf32, #tpu.memory_space<vmem>>, vector<1x128xf32>
      %21 = vector.broadcast %20 : vector<1x128xf32> to vector<128x128xf32>
      %22 = arith.addf %19, %21 : vector<128x128xf32>
      %cst_22 = arith.constant 0.000000e+00 : f32
      %23 = vector.broadcast %cst_22 : f32 to vector<128x128xf32>
      %24 = arith.maximumf %22, %23 : vector<128x128xf32>
      %25 = arith.truncf %24 : vector<128x128xf32> to vector<128x128xbf16>
      %c0_23 = arith.constant 0 : index
      %c0_24 = arith.constant 0 : index
      %26 = vector.load %arg8[%c0_23, %c0_24] : memref<128x128xbf16, #tpu.memory_space<vmem>>, vector<128x128xbf16>
      tpu.vector_store %arg8[%c0_23, %c0_24], %25 {strides = array<i32>} : memref<128x128xbf16, #tpu.memory_space<vmem>>, vector<128x128xbf16>,
    } else {
    }
    return
  }
  func.func @transform_0(%arg0: i32, %arg1: i32) -> (i32, i32) {
    %c0_i32 = arith.constant 0 : i32
    return %arg0, %arg1 : i32, i32
  }
  func.func @transform_1(%arg0: i32, %arg1: i32) -> (i32, i32) {
    %c0_i32 = arith.constant 0 : i32
    %c0_i32_0 = arith.constant 0 : i32
    return %arg1, %c0_i32 : i32, i32
  }
  func.func @transform_2(%arg0: i32, %arg1: i32) -> (i32, i32) {
    %c0_i32 = arith.constant 0 : i32
    %c0_i32_0 = arith.constant 0 : i32
    return %arg0, %c0_i32 : i32, i32
  }
  func.func @transform_3(%arg0: i32, %arg1: i32) -> (i32, i32) {
    %c0_i32 = arith.constant 0 : i32
    %c0_i32_0 = arith.constant 0 : i32
    %c0_i32_1 = arith.constant 0 : i32
    return %c0_i32, %c0_i32_0 : i32, i32
  }
  func.func @transform_4(%arg0: i32, %arg1: i32) -> (i32, i32) {
    %c0_i32 = arith.constant 0 : i32
    %c0_i32_0 = arith.constant 0 : i32
    %c0_i32_1 = arith.constant 0 : i32
    return %c0_i32, %c0_i32_0 : i32, i32
  }
  func.func @transform_5(%arg0: i32, %arg1: i32) -> (i32, i32) {
    %c0_i32 = arith.constant 0 : i32
    %c0_i32_0 = arith.constant 0 : i32
    %c0_i32_1 = arith.constant 0 : i32
    return %c0_i32, %c0_i32_0 : i32, i32
  }
  func.func @transform_6(%arg0: i32, %arg1: i32) -> (i32, i32) {
    %c0_i32 = arith.constant 0 : i32
    %c0_i32_0 = arith.constant 0 : i32
    return %arg0, %c0_i32 : i32, i32
  }
}

module attributes {stable_mosaic.version = 11 : i64} {
  func.func @_gram_kernel(%arg0: i32, %arg1: i32, %arg2: memref<128x128xbf16, #tpu.memory_space<vmem>>, %arg3: memref<128x128xbf16, #tpu.memory_space<vmem>>, %arg4: memref<128x128xf32, #tpu.memory_space<vmem>>) attributes {dimension_semantics = [#tpu.dimension_semantics<parallel>, #tpu.dimension_semantics<parallel>], iteration_bounds = array<i64: 1, 1>, scalar_prefetch = 0 : i64, scratch_operands = 0 : i64, tpu.core_type = #tpu.core_type<tc>, window_params = [{transform_indices = @transform_0, window_bounds = array<i64: 128, 128>}, {transform_indices = @transform_1, window_bounds = array<i64: 128, 128>}, {transform_indices = @transform_2, window_bounds = array<i64: 128, 128>}]} {
    %c0 = arith.constant 0 : index
    %c0_0 = arith.constant 0 : index
    %0 = vector.load %arg2[%c0, %c0_0] : memref<128x128xbf16, #tpu.memory_space<vmem>>, vector<128x128xbf16>
    %c0_1 = arith.constant 0 : index
    %c0_2 = arith.constant 0 : index
    %1 = vector.load %arg3[%c0_1, %c0_2] : memref<128x128xbf16, #tpu.memory_space<vmem>>, vector<128x128xbf16>
    %cst = arith.constant dense<0.000000e+00> : vector<128x128xf32>
    %2 = tpu.matmul %0, %1, %cst {dimension_numbers = #tpu.dot_dimension_numbers<[1], [0], [0], [1], [0, 0, 1, 1], [], []>} : vector<128x128xbf16>, vector<128x128xbf16>, vector<128x128xf32> -> vector<128x128xf32>
    %c0_3 = arith.constant 0 : index
    %c0_4 = arith.constant 0 : index
    %3 = vector.load %arg4[%c0_3, %c0_4] : memref<128x128xf32, #tpu.memory_space<vmem>>, vector<128x128xf32>
    tpu.vector_store %arg4[%c0_3, %c0_4], %2 {strides = array<i32>} : memref<128x128xf32, #tpu.memory_space<vmem>>, vector<128x128xf32>,
    return
  }
  func.func @transform_0(%arg0: i32, %arg1: i32) -> (i32, i32) {
    %c0_i32 = arith.constant 0 : i32
    %c0_i32_0 = arith.constant 0 : i32
    return %arg0, %c0_i32 : i32, i32
  }
  func.func @transform_1(%arg0: i32, %arg1: i32) -> (i32, i32) {
    %c0_i32 = arith.constant 0 : i32
    %c0_i32_0 = arith.constant 0 : i32
    return %c0_i32, %arg1 : i32, i32
  }
  func.func @transform_2(%arg0: i32, %arg1: i32) -> (i32, i32) {
    %c0_i32 = arith.constant 0 : i32
    return %arg0, %arg1 : i32, i32
  }
}

module attributes {stable_mosaic.version = 11 : i64} {
  func.func @_wsage_layers_kernel(%arg0: i32, %arg1: i32, %arg2: i32, %arg3: memref<128x128xbf16, #tpu.memory_space<vmem>>, %arg4: memref<128x128xbf16, #tpu.memory_space<vmem>>, %arg5: memref<1x128x128xbf16, #tpu.memory_space<vmem>>, %arg6: memref<1x128x128xbf16, #tpu.memory_space<vmem>>, %arg7: memref<1x1x128xf32, #tpu.memory_space<vmem>>, %arg8: memref<128x128xbf16, #tpu.memory_space<vmem>>, %arg9: memref<128x128xf32, #tpu.memory_space<vmem>>, %arg10: memref<128x128xbf16, #tpu.memory_space<vmem>>, %arg11: memref<128x128xbf16, #tpu.memory_space<vmem>>) attributes {dimension_semantics = [#tpu.dimension_semantics<arbitrary>, #tpu.dimension_semantics<arbitrary>, #tpu.dimension_semantics<arbitrary>], iteration_bounds = array<i64: 2, 1, 1>, scalar_prefetch = 0 : i64, scratch_operands = 3 : i64, tpu.core_type = #tpu.core_type<tc>, window_params = [{transform_indices = @transform_0, window_bounds = array<i64: 128, 128>}, {pipeline_mode = #tpu.pipeline_mode<synchronous>, transform_indices = @transform_1, window_bounds = array<i64: 128, 128>}, {transform_indices = @transform_2, window_bounds = array<i64: 1, 128, 128>}, {transform_indices = @transform_3, window_bounds = array<i64: 1, 128, 128>}, {transform_indices = @transform_4, window_bounds = array<i64: 1, 1, 128>}, {transform_indices = @transform_5, window_bounds = array<i64: 128, 128>}]} {
    %c2_i32 = arith.constant 2 : i32
    %c0_i32 = arith.constant 0 : i32
    %0 = arith.cmpi eq, %c2_i32, %c0_i32 : i32
    %c1_i32 = arith.constant 1 : i32
    %1 = arith.select %0, %c1_i32, %c2_i32 : i32
    %2 = arith.remsi %arg0, %1 : i32
    %c0_i32_0 = arith.constant 0 : i32
    %3 = arith.cmpi ne, %2, %c0_i32_0 : i32
    %c0_i32_1 = arith.constant 0 : i32
    %4 = arith.cmpi slt, %2, %c0_i32_1 : i32
    %c0_i32_2 = arith.constant 0 : i32
    %5 = arith.cmpi slt, %1, %c0_i32_2 : i32
    %6 = arith.xori %4, %5 : i1
    %7 = arith.andi %6, %3 : i1
    %8 = arith.addi %2, %1 : i32
    %9 = arith.select %7, %8, %2 : i32
    %c0_i32_3 = arith.constant 0 : i32
    %10 = arith.cmpi eq, %arg0, %c0_i32_3 : i32
    %c0_i32_4 = arith.constant 0 : i32
    %11 = arith.cmpi eq, %arg1, %c0_i32_4 : i32
    %c0_i32_5 = arith.constant 0 : i32
    %12 = arith.cmpi eq, %arg2, %c0_i32_5 : i32
    %13 = arith.andi %11, %12 : i1
    %14 = arith.andi %10, %13 : i1
    %15 = arith.extui %14 : i1 to i32
    %c0_i32_6 = arith.constant 0 : i32
    %16 = arith.cmpi ne, %15, %c0_i32_6 : i32
    scf.if %16 {
      %c0 = arith.constant 0 : index
      %c0_15 = arith.constant 0 : index
      %31 = vector.load %arg4[%c0, %c0_15] : memref<128x128xbf16, #tpu.memory_space<vmem>>, vector<128x128xbf16>
      %c0_16 = arith.constant 0 : index
      %c0_17 = arith.constant 0 : index
      %32 = vector.load %arg10[%c0_16, %c0_17] : memref<128x128xbf16, #tpu.memory_space<vmem>>, vector<128x128xbf16>
      tpu.vector_store %arg10[%c0_16, %c0_17], %31 {strides = array<i32>} : memref<128x128xbf16, #tpu.memory_space<vmem>>, vector<128x128xbf16>,
    } else {
    }
    %c0_i32_7 = arith.constant 0 : i32
    %17 = arith.cmpi eq, %arg2, %c0_i32_7 : i32
    %18 = arith.extui %17 : i1 to i32
    %c0_i32_8 = arith.constant 0 : i32
    %19 = arith.cmpi ne, %18, %c0_i32_8 : i32
    scf.if %19 {
      %cst = arith.constant 0.000000e+00 : f32
      %31 = vector.broadcast %cst : f32 to vector<128x128xf32>
      %c0 = arith.constant 0 : index
      %c0_15 = arith.constant 0 : index
      %32 = vector.load %arg9[%c0, %c0_15] : memref<128x128xf32, #tpu.memory_space<vmem>>, vector<128x128xf32>
      tpu.vector_store %arg9[%c0, %c0_15], %31 {strides = array<i32>} : memref<128x128xf32, #tpu.memory_space<vmem>>, vector<128x128xf32>,
    } else {
    }
    %c128_i32 = arith.constant 128 : i32
    %20 = arith.muli %arg2, %c128_i32 : i32
    %21 = tpu.assume_multiple %20, 128 : i32
    %c0_i32_9 = arith.constant 0 : i32
    %22 = arith.cmpi eq, %9, %c0_i32_9 : i32
    %23 = arith.extui %22 : i1 to i32
    %c0_i32_10 = arith.constant 0 : i32
    %24 = arith.cmpi ne, %23, %c0_i32_10 : i32
    scf.if %24 {
      %c0 = arith.constant 0 : index
      %c0_15 = arith.constant 0 : index
      %31 = vector.load %arg9[%c0, %c0_15] : memref<128x128xf32, #tpu.memory_space<vmem>>, vector<128x128xf32>
      %c0_16 = arith.constant 0 : index
      %c0_17 = arith.constant 0 : index
      %32 = vector.load %arg3[%c0_16, %c0_17] : memref<128x128xbf16, #tpu.memory_space<vmem>>, vector<128x128xbf16>
      %33 = arith.index_cast %21 : i32 to index
      %c0_18 = arith.constant 0 : index
      %34 = vector.load %arg10[%33, %c0_18] : memref<128x128xbf16, #tpu.memory_space<vmem>>, vector<128x128xbf16>
      %cst = arith.constant dense<0.000000e+00> : vector<128x128xf32>
      %35 = tpu.matmul %32, %34, %cst {dimension_numbers = #tpu.dot_dimension_numbers<[1], [0], [0], [1], [0, 0, 1, 1], [], []>} : vector<128x128xbf16>, vector<128x128xbf16>, vector<128x128xf32> -> vector<128x128xf32>
      %36 = arith.addf %31, %35 : vector<128x128xf32>
      %c0_19 = arith.constant 0 : index
      %c0_20 = arith.constant 0 : index
      %37 = vector.load %arg9[%c0_19, %c0_20] : memref<128x128xf32, #tpu.memory_space<vmem>>, vector<128x128xf32>
      tpu.vector_store %arg9[%c0_19, %c0_20], %36 {strides = array<i32>} : memref<128x128xf32, #tpu.memory_space<vmem>>, vector<128x128xf32>,
    } else {
    }
    %c1_i32_11 = arith.constant 1 : i32
    %25 = arith.cmpi eq, %9, %c1_i32_11 : i32
    %26 = arith.extui %25 : i1 to i32
    %c0_i32_12 = arith.constant 0 : i32
    %27 = arith.cmpi ne, %26, %c0_i32_12 : i32
    scf.if %27 {
      %c0 = arith.constant 0 : index
      %c0_15 = arith.constant 0 : index
      %31 = vector.load %arg9[%c0, %c0_15] : memref<128x128xf32, #tpu.memory_space<vmem>>, vector<128x128xf32>
      %c0_16 = arith.constant 0 : index
      %c0_17 = arith.constant 0 : index
      %32 = vector.load %arg3[%c0_16, %c0_17] : memref<128x128xbf16, #tpu.memory_space<vmem>>, vector<128x128xbf16>
      %33 = arith.index_cast %21 : i32 to index
      %c0_18 = arith.constant 0 : index
      %34 = vector.load %arg11[%33, %c0_18] : memref<128x128xbf16, #tpu.memory_space<vmem>>, vector<128x128xbf16>
      %cst = arith.constant dense<0.000000e+00> : vector<128x128xf32>
      %35 = tpu.matmul %32, %34, %cst {dimension_numbers = #tpu.dot_dimension_numbers<[1], [0], [0], [1], [0, 0, 1, 1], [], []>} : vector<128x128xbf16>, vector<128x128xbf16>, vector<128x128xf32> -> vector<128x128xf32>
      %36 = arith.addf %31, %35 : vector<128x128xf32>
      %c0_19 = arith.constant 0 : index
      %c0_20 = arith.constant 0 : index
      %37 = vector.load %arg9[%c0_19, %c0_20] : memref<128x128xf32, #tpu.memory_space<vmem>>, vector<128x128xf32>
      tpu.vector_store %arg9[%c0_19, %c0_20], %36 {strides = array<i32>} : memref<128x128xf32, #tpu.memory_space<vmem>>, vector<128x128xf32>,
    } else {
    }
    %c0_i32_13 = arith.constant 0 : i32
    %28 = arith.cmpi eq, %arg2, %c0_i32_13 : i32
    %29 = arith.extui %28 : i1 to i32
    %c0_i32_14 = arith.constant 0 : i32
    %30 = arith.cmpi ne, %29, %c0_i32_14 : i32
    scf.if %30 {
      %c128_i32_15 = arith.constant 128 : i32
      %31 = arith.muli %arg1, %c128_i32_15 : i32
      %32 = tpu.assume_multiple %31, 128 : i32
      %c0 = arith.constant 0 : index
      %c0_16 = arith.constant 0 : index
      %33 = vector.load %arg9[%c0, %c0_16] : memref<128x128xf32, #tpu.memory_space<vmem>>, vector<128x128xf32>
      %34 = arith.truncf %33 : vector<128x128xf32> to vector<128x128xbf16>
      %c0_17 = arith.constant 0 : index
      %c0_18 = arith.constant 0 : index
      %c0_19 = arith.constant 0 : index
      %35 = vector.load %arg5[%c0_17, %c0_18, %c0_19] : memref<1x128x128xbf16, #tpu.memory_space<vmem>>, vector<1x128x128xbf16>
      %36 = vector.shape_cast %35 : vector<1x128x128xbf16> to vector<128x128xbf16>
      %cst = arith.constant dense<0.000000e+00> : vector<128x128xf32>
      %37 = tpu.matmul %34, %36, %cst {dimension_numbers = #tpu.dot_dimension_numbers<[1], [0], [0], [1], [0, 0, 1, 1], [], []>} : vector<128x128xbf16>, vector<128x128xbf16>, vector<128x128xf32> -> vector<128x128xf32>
      %c0_i32_20 = arith.constant 0 : i32
      %38 = arith.cmpi eq, %9, %c0_i32_20 : i32
      %39 = arith.extui %38 : i1 to i32
      %c0_i32_21 = arith.constant 0 : i32
      %40 = arith.cmpi ne, %39, %c0_i32_21 : i32
      scf.if %40 {
        %44 = arith.index_cast %32 : i32 to index
        %c0_24 = arith.constant 0 : index
        %45 = vector.load %arg10[%44, %c0_24] : memref<128x128xbf16, #tpu.memory_space<vmem>>, vector<128x128xbf16>
        %c0_25 = arith.constant 0 : index
        %c0_26 = arith.constant 0 : index
        %c0_27 = arith.constant 0 : index
        %46 = vector.load %arg6[%c0_25, %c0_26, %c0_27] : memref<1x128x128xbf16, #tpu.memory_space<vmem>>, vector<1x128x128xbf16>
        %47 = vector.shape_cast %46 : vector<1x128x128xbf16> to vector<128x128xbf16>
        %cst_28 = arith.constant dense<0.000000e+00> : vector<128x128xf32>
        %48 = tpu.matmul %45, %47, %cst_28 {dimension_numbers = #tpu.dot_dimension_numbers<[1], [0], [0], [1], [0, 0, 1, 1], [], []>} : vector<128x128xbf16>, vector<128x128xbf16>, vector<128x128xf32> -> vector<128x128xf32>
        %49 = arith.addf %37, %48 : vector<128x128xf32>
        %c0_29 = arith.constant 0 : index
        %c0_30 = arith.constant 0 : index
        %c0_31 = arith.constant 0 : index
        %50 = vector.load %arg7[%c0_29, %c0_30, %c0_31] : memref<1x1x128xf32, #tpu.memory_space<vmem>>, vector<1x1x128xf32>
        %51 = vector.shape_cast %50 : vector<1x1x128xf32> to vector<1x128xf32>
        %52 = vector.broadcast %51 : vector<1x128xf32> to vector<128x128xf32>
        %53 = arith.addf %49, %52 : vector<128x128xf32>
        %cst_32 = arith.constant 0.000000e+00 : f32
        %54 = vector.broadcast %cst_32 : f32 to vector<128x128xf32>
        %55 = arith.maximumf %53, %54 : vector<128x128xf32>
        %56 = arith.truncf %55 : vector<128x128xf32> to vector<128x128xbf16>
        %57 = arith.index_cast %32 : i32 to index
        %c0_33 = arith.constant 0 : index
        %58 = vector.load %arg11[%57, %c0_33] : memref<128x128xbf16, #tpu.memory_space<vmem>>, vector<128x128xbf16>
        tpu.vector_store %arg11[%57, %c0_33], %56 {strides = array<i32>} : memref<128x128xbf16, #tpu.memory_space<vmem>>, vector<128x128xbf16>,
        %c0_34 = arith.constant 0 : index
        %c0_35 = arith.constant 0 : index
        %59 = vector.load %arg8[%c0_34, %c0_35] : memref<128x128xbf16, #tpu.memory_space<vmem>>, vector<128x128xbf16>
        tpu.vector_store %arg8[%c0_34, %c0_35], %56 {strides = array<i32>} : memref<128x128xbf16, #tpu.memory_space<vmem>>, vector<128x128xbf16>,
      } else {
      }
      %c1_i32_22 = arith.constant 1 : i32
      %41 = arith.cmpi eq, %9, %c1_i32_22 : i32
      %42 = arith.extui %41 : i1 to i32
      %c0_i32_23 = arith.constant 0 : i32
      %43 = arith.cmpi ne, %42, %c0_i32_23 : i32
      scf.if %43 {
        %44 = arith.index_cast %32 : i32 to index
        %c0_24 = arith.constant 0 : index
        %45 = vector.load %arg11[%44, %c0_24] : memref<128x128xbf16, #tpu.memory_space<vmem>>, vector<128x128xbf16>
        %c0_25 = arith.constant 0 : index
        %c0_26 = arith.constant 0 : index
        %c0_27 = arith.constant 0 : index
        %46 = vector.load %arg6[%c0_25, %c0_26, %c0_27] : memref<1x128x128xbf16, #tpu.memory_space<vmem>>, vector<1x128x128xbf16>
        %47 = vector.shape_cast %46 : vector<1x128x128xbf16> to vector<128x128xbf16>
        %cst_28 = arith.constant dense<0.000000e+00> : vector<128x128xf32>
        %48 = tpu.matmul %45, %47, %cst_28 {dimension_numbers = #tpu.dot_dimension_numbers<[1], [0], [0], [1], [0, 0, 1, 1], [], []>} : vector<128x128xbf16>, vector<128x128xbf16>, vector<128x128xf32> -> vector<128x128xf32>
        %49 = arith.addf %37, %48 : vector<128x128xf32>
        %c0_29 = arith.constant 0 : index
        %c0_30 = arith.constant 0 : index
        %c0_31 = arith.constant 0 : index
        %50 = vector.load %arg7[%c0_29, %c0_30, %c0_31] : memref<1x1x128xf32, #tpu.memory_space<vmem>>, vector<1x1x128xf32>
        %51 = vector.shape_cast %50 : vector<1x1x128xf32> to vector<1x128xf32>
        %52 = vector.broadcast %51 : vector<1x128xf32> to vector<128x128xf32>
        %53 = arith.addf %49, %52 : vector<128x128xf32>
        %cst_32 = arith.constant 0.000000e+00 : f32
        %54 = vector.broadcast %cst_32 : f32 to vector<128x128xf32>
        %55 = arith.maximumf %53, %54 : vector<128x128xf32>
        %56 = arith.truncf %55 : vector<128x128xf32> to vector<128x128xbf16>
        %57 = arith.index_cast %32 : i32 to index
        %c0_33 = arith.constant 0 : index
        %58 = vector.load %arg10[%57, %c0_33] : memref<128x128xbf16, #tpu.memory_space<vmem>>, vector<128x128xbf16>
        tpu.vector_store %arg10[%57, %c0_33], %56 {strides = array<i32>} : memref<128x128xbf16, #tpu.memory_space<vmem>>, vector<128x128xbf16>,
        %c0_34 = arith.constant 0 : index
        %c0_35 = arith.constant 0 : index
        %59 = vector.load %arg8[%c0_34, %c0_35] : memref<128x128xbf16, #tpu.memory_space<vmem>>, vector<128x128xbf16>
        tpu.vector_store %arg8[%c0_34, %c0_35], %56 {strides = array<i32>} : memref<128x128xbf16, #tpu.memory_space<vmem>>, vector<128x128xbf16>,
      } else {
      }
    } else {
    }
    return
  }
  func.func @transform_0(%arg0: i32, %arg1: i32, %arg2: i32) -> (i32, i32) {
    %c0_i32 = arith.constant 0 : i32
    return %arg1, %arg2 : i32, i32
  }
  func.func @transform_1(%arg0: i32, %arg1: i32, %arg2: i32) -> (i32, i32) {
    %c0_i32 = arith.constant 0 : i32
    %c0_i32_0 = arith.constant 0 : i32
    %c0_i32_1 = arith.constant 0 : i32
    return %c0_i32, %c0_i32_0 : i32, i32
  }
  func.func @transform_2(%arg0: i32, %arg1: i32, %arg2: i32) -> (i32, i32, i32) {
    %c0_i32 = arith.constant 0 : i32
    %c0_i32_0 = arith.constant 0 : i32
    %c0_i32_1 = arith.constant 0 : i32
    return %arg0, %c0_i32, %c0_i32_0 : i32, i32, i32
  }
  func.func @transform_3(%arg0: i32, %arg1: i32, %arg2: i32) -> (i32, i32, i32) {
    %c0_i32 = arith.constant 0 : i32
    %c0_i32_0 = arith.constant 0 : i32
    %c0_i32_1 = arith.constant 0 : i32
    return %arg0, %c0_i32, %c0_i32_0 : i32, i32, i32
  }
  func.func @transform_4(%arg0: i32, %arg1: i32, %arg2: i32) -> (i32, i32, i32) {
    %c0_i32 = arith.constant 0 : i32
    %c0_i32_0 = arith.constant 0 : i32
    %c0_i32_1 = arith.constant 0 : i32
    return %arg0, %c0_i32, %c0_i32_0 : i32, i32, i32
  }
  func.func @transform_5(%arg0: i32, %arg1: i32, %arg2: i32) -> (i32, i32) {
    %c0_i32 = arith.constant 0 : i32
    %c0_i32_0 = arith.constant 0 : i32
    return %arg1, %c0_i32 : i32, i32
  }
}

module attributes {stable_mosaic.version = 11 : i64} {
  func.func @_head_kernel(%arg0: i32, %arg1: memref<2x128xbf16, #tpu.memory_space<vmem>>, %arg2: memref<128x128xbf16, #tpu.memory_space<vmem>>, %arg3: memref<128x128xbf16, #tpu.memory_space<vmem>>, %arg4: memref<1x128xf32, #tpu.memory_space<vmem>>, %arg5: memref<128x128xbf16, #tpu.memory_space<vmem>>, %arg6: memref<1x128xf32, #tpu.memory_space<vmem>>, %arg7: memref<2x128xf32, #tpu.memory_space<vmem>>, %arg8: memref<2x128xf32, #tpu.memory_space<vmem>>) attributes {dimension_semantics = [#tpu.dimension_semantics<arbitrary>], iteration_bounds = array<i64: 1>, scalar_prefetch = 0 : i64, scratch_operands = 1 : i64, tpu.core_type = #tpu.core_type<tc>, window_params = [{transform_indices = @transform_0, window_bounds = array<i64: 2, 128>}, {transform_indices = @transform_1, window_bounds = array<i64: 128, 128>}, {pipeline_mode = #tpu.pipeline_mode<synchronous>, transform_indices = @transform_2, window_bounds = array<i64: 128, 128>}, {pipeline_mode = #tpu.pipeline_mode<synchronous>, transform_indices = @transform_3, window_bounds = array<i64: 1, 128>}, {pipeline_mode = #tpu.pipeline_mode<synchronous>, transform_indices = @transform_4, window_bounds = array<i64: 128, 128>}, {pipeline_mode = #tpu.pipeline_mode<synchronous>, transform_indices = @transform_5, window_bounds = array<i64: 1, 128>}, {pipeline_mode = #tpu.pipeline_mode<synchronous>, transform_indices = @transform_6, window_bounds = array<i64: 2, 128>}]} {
    %c0_i32 = arith.constant 0 : i32
    %0 = arith.cmpi eq, %arg0, %c0_i32 : i32
    %1 = arith.extui %0 : i1 to i32
    %c0_i32_0 = arith.constant 0 : i32
    %2 = arith.cmpi ne, %1, %c0_i32_0 : i32
    scf.if %2 {
      %cst_10 = arith.constant 0.000000e+00 : f32
      %12 = vector.broadcast %cst_10 : f32 to vector<2x128xf32>
      %c0_11 = arith.constant 0 : index
      %c0_12 = arith.constant 0 : index
      %13 = vector.load %arg8[%c0_11, %c0_12] : memref<2x128xf32, #tpu.memory_space<vmem>>, vector<2x128xf32>
      tpu.vector_store %arg8[%c0_11, %c0_12], %12 {strides = array<i32>} : memref<2x128xf32, #tpu.memory_space<vmem>>, vector<2x128xf32>,
    } else {
    }
    %c0 = arith.constant 0 : index
    %c0_1 = arith.constant 0 : index
    %3 = vector.load %arg8[%c0, %c0_1] : memref<2x128xf32, #tpu.memory_space<vmem>>, vector<2x128xf32>
    %c0_2 = arith.constant 0 : index
    %c0_3 = arith.constant 0 : index
    %4 = vector.load %arg1[%c0_2, %c0_3] : memref<2x128xbf16, #tpu.memory_space<vmem>>, vector<2x128xbf16>
    %c0_4 = arith.constant 0 : index
    %c0_5 = arith.constant 0 : index
    %5 = vector.load %arg2[%c0_4, %c0_5] : memref<128x128xbf16, #tpu.memory_space<vmem>>, vector<128x128xbf16>
    %cst = arith.constant dense<0.000000e+00> : vector<2x128xf32>
    %6 = tpu.matmul %4, %5, %cst {dimension_numbers = #tpu.dot_dimension_numbers<[1], [0], [0], [1], [0, 0, 1, 1], [], []>} : vector<2x128xbf16>, vector<128x128xbf16>, vector<2x128xf32> -> vector<2x128xf32>
    %7 = arith.addf %3, %6 : vector<2x128xf32>
    %c0_6 = arith.constant 0 : index
    %c0_7 = arith.constant 0 : index
    %8 = vector.load %arg8[%c0_6, %c0_7] : memref<2x128xf32, #tpu.memory_space<vmem>>, vector<2x128xf32>
    tpu.vector_store %arg8[%c0_6, %c0_7], %7 {strides = array<i32>} : memref<2x128xf32, #tpu.memory_space<vmem>>, vector<2x128xf32>,
    %c0_i32_8 = arith.constant 0 : i32
    %9 = arith.cmpi eq, %arg0, %c0_i32_8 : i32
    %10 = arith.extui %9 : i1 to i32
    %c0_i32_9 = arith.constant 0 : i32
    %11 = arith.cmpi ne, %10, %c0_i32_9 : i32
    scf.if %11 {
      %c0_10 = arith.constant 0 : index
      %c0_11 = arith.constant 0 : index
      %12 = vector.load %arg8[%c0_10, %c0_11] : memref<2x128xf32, #tpu.memory_space<vmem>>, vector<2x128xf32>
      %13 = arith.truncf %12 : vector<2x128xf32> to vector<2x128xbf16>
      %c0_12 = arith.constant 0 : index
      %c0_13 = arith.constant 0 : index
      %14 = vector.load %arg3[%c0_12, %c0_13] : memref<128x128xbf16, #tpu.memory_space<vmem>>, vector<128x128xbf16>
      %cst_14 = arith.constant dense<0.000000e+00> : vector<2x128xf32>
      %15 = tpu.matmul %13, %14, %cst_14 {dimension_numbers = #tpu.dot_dimension_numbers<[1], [0], [0], [1], [0, 0, 1, 1], [], []>} : vector<2x128xbf16>, vector<128x128xbf16>, vector<2x128xf32> -> vector<2x128xf32>
      %c0_15 = arith.constant 0 : index
      %c0_16 = arith.constant 0 : index
      %16 = vector.load %arg4[%c0_15, %c0_16] : memref<1x128xf32, #tpu.memory_space<vmem>>, vector<1x128xf32>
      %17 = vector.broadcast %16 : vector<1x128xf32> to vector<2x128xf32>
      %18 = arith.addf %15, %17 : vector<2x128xf32>
      %cst_17 = arith.constant 0.000000e+00 : f32
      %19 = vector.broadcast %cst_17 : f32 to vector<2x128xf32>
      %20 = arith.maximumf %18, %19 : vector<2x128xf32>
      %21 = arith.truncf %20 : vector<2x128xf32> to vector<2x128xbf16>
      %c0_18 = arith.constant 0 : index
      %c0_19 = arith.constant 0 : index
      %22 = vector.load %arg5[%c0_18, %c0_19] : memref<128x128xbf16, #tpu.memory_space<vmem>>, vector<128x128xbf16>
      %cst_20 = arith.constant dense<0.000000e+00> : vector<2x128xf32>
      %23 = tpu.matmul %21, %22, %cst_20 {dimension_numbers = #tpu.dot_dimension_numbers<[1], [0], [0], [1], [0, 0, 1, 1], [], []>} : vector<2x128xbf16>, vector<128x128xbf16>, vector<2x128xf32> -> vector<2x128xf32>
      %c0_21 = arith.constant 0 : index
      %c0_22 = arith.constant 0 : index
      %24 = vector.load %arg6[%c0_21, %c0_22] : memref<1x128xf32, #tpu.memory_space<vmem>>, vector<1x128xf32>
      %25 = vector.broadcast %24 : vector<1x128xf32> to vector<2x128xf32>
      %26 = arith.addf %23, %25 : vector<2x128xf32>
      %cst_23 = arith.constant dense<0xFF800000> : vector<2xf32>
      %27 = vector.multi_reduction <maximumf>, %26, %cst_23 [1] : vector<2x128xf32> to vector<2xf32>
      %28 = vector.shape_cast %27 : vector<2xf32> to vector<2x1xf32>
      %29 = vector.broadcast %28 : vector<2x1xf32> to vector<2x128xf32>
      %30 = arith.subf %26, %29 : vector<2x128xf32>
      %31 = math.exp %30 : vector<2x128xf32>
      %cst_24 = arith.constant dense<0.000000e+00> : vector<2xf32>
      %32 = vector.multi_reduction <add>, %31, %cst_24 [1] : vector<2x128xf32> to vector<2xf32>
      %33 = vector.shape_cast %32 : vector<2xf32> to vector<2x1xf32>
      %34 = math.log %33 : vector<2x1xf32>
      %35 = vector.broadcast %34 : vector<2x1xf32> to vector<2x128xf32>
      %36 = arith.subf %30, %35 : vector<2x128xf32>
      %c0_25 = arith.constant 0 : index
      %c0_26 = arith.constant 0 : index
      %37 = vector.load %arg7[%c0_25, %c0_26] : memref<2x128xf32, #tpu.memory_space<vmem>>, vector<2x128xf32>
      tpu.vector_store %arg7[%c0_25, %c0_26], %36 {strides = array<i32>} : memref<2x128xf32, #tpu.memory_space<vmem>>, vector<2x128xf32>,
    } else {
    }
    return
  }
  func.func @transform_0(%arg0: i32) -> (i32, i32) {
    %c0_i32 = arith.constant 0 : i32
    %c0_i32_0 = arith.constant 0 : i32
    return %c0_i32, %arg0 : i32, i32
  }
  func.func @transform_1(%arg0: i32) -> (i32, i32) {
    %c0_i32 = arith.constant 0 : i32
    %c0_i32_0 = arith.constant 0 : i32
    return %arg0, %c0_i32 : i32, i32
  }
  func.func @transform_2(%arg0: i32) -> (i32, i32) {
    %c0_i32 = arith.constant 0 : i32
    %c0_i32_0 = arith.constant 0 : i32
    %c0_i32_1 = arith.constant 0 : i32
    return %c0_i32, %c0_i32_0 : i32, i32
  }
  func.func @transform_3(%arg0: i32) -> (i32, i32) {
    %c0_i32 = arith.constant 0 : i32
    %c0_i32_0 = arith.constant 0 : i32
    %c0_i32_1 = arith.constant 0 : i32
    return %c0_i32, %c0_i32_0 : i32, i32
  }
  func.func @transform_4(%arg0: i32) -> (i32, i32) {
    %c0_i32 = arith.constant 0 : i32
    %c0_i32_0 = arith.constant 0 : i32
    %c0_i32_1 = arith.constant 0 : i32
    return %c0_i32, %c0_i32_0 : i32, i32
  }
  func.func @transform_5(%arg0: i32) -> (i32, i32) {
    %c0_i32 = arith.constant 0 : i32
    %c0_i32_0 = arith.constant 0 : i32
    %c0_i32_1 = arith.constant 0 : i32
    return %c0_i32, %c0_i32_0 : i32, i32
  }
  func.func @transform_6(%arg0: i32) -> (i32, i32) {
    %c0_i32 = arith.constant 0 : i32
    %c0_i32_0 = arith.constant 0 : i32
    %c0_i32_1 = arith.constant 0 : i32
    return %c0_i32, %c0_i32_0 : i32, i32
  }
}

</mosaic_0001>

<bundles_post_ra>
// kernel: l2x_gsg_forward.5
= control target key start
LH: loop header
LB: loop body
LE: loop exit
PB: predicated region body
PF: predicated region fallthrough
CT: control target
= control target key end

     0   :  { %s464_s1 = inlined_call_operand.vmem [shape: bf16[128,128], index: 1, kind: input, shape index: {}]   ;;  %s465_s0 = inlined_call_operand.vmem [shape: bf16[128,128], index: 0, kind: input, shape index: {}]   ;;  %s466_s2 = inlined_call_operand.vmem [shape: f32[128,128], index: 2, kind: output, shape index: {}]  }
   0x1   :  { %v337_v0 = vld [vmem:[%s464_s1] sm:$0xff]   ;;  %v338_v1 = vld [vmem:[%s464_s1 + $0x8] sm:$0xff]   ;;  %v339_v2 = vld [vmem:[%s464_s1 + $0x10] sm:$0xff]  }
   0x2   :  { %289 = vmatprep.subr.bf16.mxu0 %v337_v0  ;;  %321 = vmatprep.subr.bf16.mxu1 %v337_v0  ;;  %v340_v3 = vld [vmem:[%s464_s1 + $0x18] sm:$0xff]   ;;  %v345_v4 = vld [vmem:[%s465_s0] sm:$0xff]   ;;  %v342_v7 = vld [vmem:[%s464_s1 + $0x28] sm:$0xff]  }
   0x3   :  { %290 = vmatpush3.bf16.msra.mxu0 %v337_v0  ;;  %329 = vmatpush3.bf16.msra.mxu1 %v337_v0  ;;  %v346_v5 = vld [vmem:[%s465_s0 + $0x20] sm:$0xff]   ;;  %v343_v8 = vld [vmem:[%s464_s1 + $0x30] sm:$0xff]   ;;  %v344_v9 = vld [vmem:[%s464_s1 + $0x38] sm:$0xff]  }
   0x4   :  { %291 = vmatprep.subr.bf16.mxu0 %v338_v1  ;;  %322 = vmatprep.subr.bf16.mxu1 %v338_v1  ;;  %v341_v6 = vld [vmem:[%s464_s1 + $0x20] sm:$0xff]   ;;  %v347_v10 = vld [vmem:[%s465_s0 + $0x8] sm:$0xff]   ;;  %v349_v12 = vld [vmem:[%s465_s0 + $0x10] sm:$0xff]  }
   0x5   :  { %305 = vmatprep.mubr.bf16.mxu0 %v345_v4  ;;  %313 = vmatprep.mubr.bf16.mxu1 %v346_v5  ;;  %v348_v11 = vld [vmem:[%s465_s0 + $0x28] sm:$0xff]   ;;  %v350_v13 = vld [vmem:[%s465_s0 + $0x30] sm:$0xff]   ;;  %v351_v14 = vld [vmem:[%s465_s0 + $0x18] sm:$0xff]  }
   0x6   :  { %v352_v15 = vld [vmem:[%s465_s0 + $0x38] sm:$0xff]  }
   0x7   :  { %292 = vmatpush3.bf16.msra.mxu0 %v338_v1  ;;  %330 = vmatpush3.bf16.msra.mxu1 %v338_v1 }
   0x8   :  { %293 = vmatprep.subr.bf16.mxu0 %v339_v2  ;;  %323 = vmatprep.subr.bf16.mxu1 %v339_v2 }
   0xb   :  { %294 = vmatpush3.bf16.msra.mxu0 %v339_v2  ;;  %331 = vmatpush3.bf16.msra.mxu1 %v339_v2 }
   0xc   :  { %295 = vmatprep.subr.bf16.mxu0 %v340_v3  ;;  %324 = vmatprep.subr.bf16.mxu1 %v340_v3 }
   0xf   :  { %296 = vmatpush3.bf16.msra.mxu0 %v340_v3  ;;  %332 = vmatpush3.bf16.msra.mxu1 %v340_v3 }
  0x10   :  { %297 = vmatprep.subr.bf16.mxu0 %v341_v6  ;;  %325 = vmatprep.subr.bf16.mxu1 %v341_v6 }
  0x13   :  { %298 = vmatpush3.bf16.msra.mxu0 %v341_v6  ;;  %333 = vmatpush3.bf16.msra.mxu1 %v341_v6 }
  0x14   :  { %299 = vmatprep.subr.bf16.mxu0 %v342_v7  ;;  %326 = vmatprep.subr.bf16.mxu1 %v342_v7 }
  0x17   :  { %300 = vmatpush3.bf16.msra.mxu0 %v342_v7  ;;  %334 = vmatpush3.bf16.msra.mxu1 %v342_v7 }
  0x18   :  { %301 = vmatprep.subr.bf16.mxu0 %v343_v8  ;;  %327 = vmatprep.subr.bf16.mxu1 %v343_v8 }
  0x1b   :  { %302 = vmatpush3.bf16.msra.mxu0 %v343_v8  ;;  %335 = vmatpush3.bf16.msra.mxu1 %v343_v8 }
  0x1c   :  { %303 = vmatprep.subr.bf16.mxu0 %v344_v9  ;;  %328 = vmatprep.subr.bf16.mxu1 %v344_v9 }
  0x1f   :  { %304 = vmatpush3.bf16.msra.mxu0 %v344_v9  ;;  %336 = vmatpush3.bf16.msra.mxu1 %v344_v9 }
  0x22   :  { %306 = vmatmul.mubr.bf16.vlgmr.msra.gmra.mrb[0].mxu0 %v347_v10  ;;  %314 = vmatmul.mubr.bf16.vlgmr.msra.gmra.mrb[0].mxu1 %v348_v11 }
  0x23   :  { %309 = vmatprep.mubr.bf16.mxu0 %v349_v12  ;;  %317 = vmatprep.mubr.bf16.mxu1 %v350_v13 }
  0x2a   :  { %310 = vmatmul.mubr.bf16.gmra.mrb[4].mxu0 %v351_v14  ;;  %318 = vmatmul.mubr.bf16.gmra.mrb[4].mxu1 %v352_v15 }
  0xf5   :  { %v307_v16 = vpop.f32.mrb[0].mxu0  ;;  %v315_v17 = vpop.f32.mrb[0].mxu1 }
  0xf6   :  { %239 = vst [vmem:[%s466_s2 + $0x10] sm:$0xff] %v307_v16  ;;  %247 = vst [vmem:[%s466_s2 + $0x50] sm:$0xff] %v315_v17  ;;  %v174_v18 = vpop.f32.mrb[1].mxu0  ;;  %v206_v19 = vpop.f32.mrb[1].mxu1 }
  0xf7   :  { %237 = vst [vmem:[%s466_s2] sm:$0xff] %v174_v18  ;;  %245 = vst [vmem:[%s466_s2 + $0x40] sm:$0xff] %v206_v19  ;;  %v308_v20 = vpop.f32.mrb[2].mxu0  ;;  %v316_v21 = vpop.f32.mrb[2].mxu1 }
  0xf8   :  { %240 = vst [vmem:[%s466_s2 + $0x18] sm:$0xff] %v308_v20  ;;  %248 = vst [vmem:[%s466_s2 + $0x58] sm:$0xff] %v316_v21  ;;  %v177_v22 = vpop.f32.mrb[3].mxu0  ;;  %v209_v23 = vpop.f32.mrb[3].mxu1 }
  0xf9   :  { %238 = vst [vmem:[%s466_s2 + $0x8] sm:$0xff] %v177_v22  ;;  %246 = vst [vmem:[%s466_s2 + $0x48] sm:$0xff] %v209_v23 }
  0xfd   :  { %v311_v24 = vpop.f32.mrb[4].mxu0  ;;  %v319_v25 = vpop.f32.mrb[4].mxu1 }
  0xfe   :  { %243 = vst [vmem:[%s466_s2 + $0x30] sm:$0xff] %v311_v24  ;;  %251 = vst [vmem:[%s466_s2 + $0x70] sm:$0xff] %v319_v25  ;;  %v190_v26 = vpop.f32.mrb[5].mxu0  ;;  %v222_v27 = vpop.f32.mrb[5].mxu1 }
  0xff   :  { %241 = vst [vmem:[%s466_s2 + $0x20] sm:$0xff] %v190_v26  ;;  %249 = vst [vmem:[%s466_s2 + $0x60] sm:$0xff] %v222_v27  ;;  %v312_v28 = vpop.f32.mrb[6].mxu0  ;;  %v320_v29 = vpop.f32.mrb[6].mxu1 }
 0x100   :  { %244 = vst [vmem:[%s466_s2 + $0x38] sm:$0xff] %v312_v28  ;;  %252 = vst [vmem:[%s466_s2 + $0x78] sm:$0xff] %v320_v29  ;;  %v193_v30 = vpop.f32.mrb[7].mxu0  ;;  %v225_v31 = vpop.f32.mrb[7].mxu1 }
 0x101   :  { %242 = vst [vmem:[%s466_s2 + $0x28] sm:$0xff] %v193_v30  ;;  %250 = vst [vmem:[%s466_s2 + $0x68] sm:$0xff] %v225_v31 }

// kernel: l2x_gsg_forward.4
= control target key start
LH: loop header
LB: loop body
LE: loop exit
PB: predicated region body
PF: predicated region fallthrough
CT: control target
= control target key end

     0   :  { %s1389_s1 = inlined_call_operand.vmem [shape: bf16[128,128], index: 1, kind: input, shape index: {}, may-alias: {1,2}]   ;;  %s1390_s0 = inlined_call_operand.vmem [shape: bf16[128,128], index: 0, kind: input, shape index: {}]   ;;  %s1391_s4 = inlined_call_operand.vmem [shape: bf16[128,128], index: 4, kind: input, shape index: {}]   ;;  %s1392_s3 = inlined_call_operand.vmem [shape: bf16[128,128], index: 3, kind: input, shape index: {}]   ;;  %s1393_s2 = inlined_call_operand.vmem [shape: bf16[128,128], index: 2, kind: input, shape index: {}, may-alias: {1,2}]   ;;  %s1394_s5 = inlined_call_operand.vmem [shape: f32[1,128], index: 5, kind: input, shape index: {}]   ;;  %s1395_s6 = inlined_call_operand.vmem [shape: bf16[128,128], index: 6, kind: output, shape index: {}]  }
   0x1   :  { %v1149_v0 = vld [vmem:[%s1389_s1] sm:$0xff]   ;;  %v1150_v1 = vld [vmem:[%s1389_s1 + $0x8] sm:$0xff]   ;;  %v1151_v2 = vld [vmem:[%s1389_s1 + $0x10] sm:$0xff]  }
   0x2   :  { %1021 = vmatprep.subr.bf16.mxu0 %v1149_v0  ;;  %v1152_v3 = vld [vmem:[%s1389_s1 + $0x18] sm:$0xff]   ;;  %v1157_v4 = vld [vmem:[%s1390_s0] sm:$0xff]   ;;  %v1154_v6 = vld [vmem:[%s1389_s1 + $0x28] sm:$0xff]  }
   0x3   :  { %1022 = vmatpush3.bf16.msra.mxu0 %v1149_v0  ;;  %1037 = vmatprep.mubr.bf16.mxu0 %v1157_v4  ;;  %v1153_v5 = vld [vmem:[%s1389_s1 + $0x20] sm:$0xff]   ;;  %v1166_v8 = vld [vmem:[%s1391_s4 + $0x8] sm:$0xff]   ;;  %v1155_v9 = vld [vmem:[%s1389_s1 + $0x30] sm:$0xff]  }
   0x4   :  { %1023 = vmatprep.subr.bf16.mxu0 %v1150_v1  ;;  %v1165_v7 = vld [vmem:[%s1391_s4] sm:$0xff]   ;;  %v1167_v10 = vld [vmem:[%s1391_s4 + $0x10] sm:$0xff]   ;;  %v1156_v11 = vld [vmem:[%s1389_s1 + $0x38] sm:$0xff]  }
   0x5   :  { %1053 = vmatprep.subr.bf16.mxu1 %v1165_v7  ;;  %v1168_v12 = vld [vmem:[%s1391_s4 + $0x18] sm:$0xff]   ;;  %v1169_v13 = vld [vmem:[%s1391_s4 + $0x20] sm:$0xff]   ;;  %v1158_v16 = vld [vmem:[%s1390_s0 + $0x8] sm:$0xff]  }
   0x6   :  { %1054 = vmatpush3.bf16.msra.mxu1 %v1165_v7  ;;  %v1176_v14 = vld [vmem:[%s1393_s2] sm:$0xff]   ;;  %v1159_v17 = vld [vmem:[%s1390_s0 + $0x10] sm:$0xff]   ;;  %v1171_v18 = vld [vmem:[%s1391_s4 + $0x28] sm:$0xff]  }
   0x7   :  { %1024 = vmatpush3.bf16.msra.mxu0 %v1150_v1  ;;  %1055 = vmatprep.subr.bf16.mxu1 %v1166_v8  ;;  %v1170_v15 = vld [vmem:[%s1392_s3] sm:$0xff]   ;;  %v1172_v19 = vld [vmem:[%s1392_s3 + $0x8] sm:$0xff]   ;;  %v1173_v20 = vld [vmem:[%s1391_s4 + $0x30] sm:$0xff]  }
   0x8   :  { %1025 = vmatprep.subr.bf16.mxu0 %v1151_v2  ;;  %1069 = vmatprep.mubr.bf16.mxu1 %v1176_v14  ;;  %v1174_v21 = vld [vmem:[%s1392_s3 + $0x10] sm:$0xff]   ;;  %v1160_v22 = vld [vmem:[%s1390_s0 + $0x18] sm:$0xff]   ;;  %v1161_v23 = vld [vmem:[%s1390_s0 + $0x20] sm:$0xff]  }
   0x9   :  { %v1175_v24 = vld [vmem:[%s1391_s4 + $0x38] sm:$0xff]   ;;  %v1179_v26 = vld [vmem:[%s1392_s3 + $0x20] sm:$0xff]   ;;  %v1162_v27 = vld [vmem:[%s1390_s0 + $0x28] sm:$0xff]  }
   0xa   :  { %1056 = vmatpush3.bf16.msra.mxu1 %v1166_v8  ;;  %v1177_v25 = vld [vmem:[%s1392_s3 + $0x18] sm:$0xff]   ;;  %v1178_v28 = vld [vmem:[%s1393_s2 + $0x8] sm:$0xff]   ;;  %v1163_v29 = vld [vmem:[%s1390_s0 + $0x30] sm:$0xff]  }
   0xb   :  { %1026 = vmatpush3.bf16.msra.mxu0 %v1151_v2  ;;  %1057 = vmatprep.subr.bf16.mxu1 %v1167_v10  ;;  %v1180_v30 = vld [vmem:[%s1393_s2 + $0x10] sm:$0xff]   ;;  %v1181_v31 = vld [vmem:[%s1392_s3 + $0x28] sm:$0xff]   ;;  %v1164_v33 = vld [vmem:[%s1390_s0 + $0x38] sm:$0xff]  }
   0xc   :  { %1027 = vmatprep.subr.bf16.mxu0 %v1152_v3  ;;  %v1183_v32 = vld [vmem:[%s1392_s3 + $0x30] sm:$0xff]   ;;  %v1182_v34 = vld [vmem:[%s1393_s2 + $0x18] sm:$0xff]   ;;  %v1185_v36 = vld [vmem:[%s1393_s2 + $0x20] sm:$0xff]  }
   0xd   :  { %v1184_v35 = vld [vmem:[%s1392_s3 + $0x38] sm:$0xff]   ;;  %v1186_v37 = vld [vmem:[%s1393_s2 + $0x28] sm:$0xff]   ;;  %v1187_v38 = vld [vmem:[%s1393_s2 + $0x30] sm:$0xff]  }
   0xe   :  { %1058 = vmatpush3.bf16.msra.mxu1 %v1167_v10  ;;  %v1188_v39 = vld [vmem:[%s1393_s2 + $0x38] sm:$0xff]  }
   0xf   :  { %1028 = vmatpush3.bf16.msra.mxu0 %v1152_v3  ;;  %1059 = vmatprep.subr.bf16.mxu1 %v1168_v12 }
  0x10   :  { %1029 = vmatprep.subr.bf16.mxu0 %v1153_v5 }
  0x12   :  { %1060 = vmatpush3.bf16.msra.mxu1 %v1168_v12 }
  0x13   :  { %1030 = vmatpush3.bf16.msra.mxu0 %v1153_v5  ;;  %1061 = vmatprep.subr.bf16.mxu1 %v1169_v13 }
  0x14   :  { %1031 = vmatprep.subr.bf16.mxu0 %v1154_v6 }
  0x16   :  { %1062 = vmatpush3.bf16.msra.mxu1 %v1169_v13 }
  0x17   :  { %1032 = vmatpush3.bf16.msra.mxu0 %v1154_v6  ;;  %1063 = vmatprep.subr.bf16.mxu1 %v1171_v18 }
  0x18   :  { %1033 = vmatprep.subr.bf16.mxu0 %v1155_v9 }
  0x1a   :  { %1064 = vmatpush3.bf16.msra.mxu1 %v1171_v18 }
  0x1b   :  { %1034 = vmatpush3.bf16.msra.mxu0 %v1155_v9  ;;  %1065 = vmatprep.subr.bf16.mxu1 %v1173_v20  ;;  %v1347_v9 = vld [vmem:[%s1394_s5] ss:$0 sm:$0xff] }
  0x1c   :  { %1035 = vmatprep.subr.bf16.mxu0 %v1156_v11 }
  0x1e   :  { %1066 = vmatpush3.bf16.msra.mxu1 %v1173_v20 }
  0x1f   :  { %1036 = vmatpush3.bf16.msra.mxu0 %v1156_v11  ;;  %1067 = vmatprep.subr.bf16.mxu1 %v1175_v24 }
  0x20   :  { %1085 = vmatprep.subr.bf16.mxu0 %v1170_v15 }
  0x22   :  { %1038 = vmatmul.mubr.bf16.vlgmr.msra.gmra.mrb[0].mxu0 %v1158_v16  ;;  %1068 = vmatpush3.bf16.msra.mxu1 %v1175_v24 }
  0x23   :  { %1041 = vmatprep.mubr.bf16.mxu0 %v1159_v17  ;;  %1086 = vmatpush3.bf16.msra.mxu0 %v1170_v15 }
  0x24   :  { %1087 = vmatprep.subr.bf16.mxu0 %v1172_v19  ;;  %1117 = vmatprep.subr.bf16.mxu1 %v1170_v15 }
  0x25   :  { %1070 = vmatmul.mubr.bf16.vlgmr.msra.gmra.mrb[0].mxu1 %v1178_v28 }
  0x26   :  { %1125 = vmatpush3.bf16.msra.mxu1 %v1170_v15  ;;  %1073 = vmatprep.mubr.bf16.mxu1 %v1180_v30 }
  0x27   :  { %1088 = vmatpush3.bf16.msra.mxu0 %v1172_v19  ;;  %1118 = vmatprep.subr.bf16.mxu1 %v1172_v19 }
  0x28   :  { %1089 = vmatprep.subr.bf16.mxu0 %v1174_v21 }
  0x2a   :  { %1042 = vmatmul.mubr.bf16.gmra.mrb[4].mxu0 %v1160_v22  ;;  %1126 = vmatpush3.bf16.msra.mxu1 %v1172_v19 }
  0x2b   :  { %1045 = vmatprep.mubr.bf16.mxu0 %v1161_v23  ;;  %1090 = vmatpush3.bf16.msra.mxu0 %v1174_v21 }
  0x2c   :  { %1091 = vmatprep.subr.bf16.mxu0 %v1177_v25  ;;  %1119 = vmatprep.subr.bf16.mxu1 %v1174_v21 }
  0x2d   :  { %1074 = vmatmul.mubr.bf16.gmra.mrb[4].mxu1 %v1182_v34 }
  0x2e   :  { %1127 = vmatpush3.bf16.msra.mxu1 %v1174_v21  ;;  %1077 = vmatprep.mubr.bf16.mxu1 %v1185_v36 }
  0x2f   :  { %1092 = vmatpush3.bf16.msra.mxu0 %v1177_v25  ;;  %1120 = vmatprep.subr.bf16.mxu1 %v1177_v25 }
  0x30   :  { %1093 = vmatprep.subr.bf16.mxu0 %v1179_v26 }
  0x32   :  { %1046 = vmatmul.mubr.bf16.gmra.mrb[8].mxu0 %v1162_v27  ;;  %1128 = vmatpush3.bf16.msra.mxu1 %v1177_v25 }
  0x33   :  { %1049 = vmatprep.mubr.bf16.mxu0 %v1163_v29  ;;  %1094 = vmatpush3.bf16.msra.mxu0 %v1179_v26 }
  0x34   :  { %1095 = vmatprep.subr.bf16.mxu0 %v1181_v31  ;;  %1121 = vmatprep.subr.bf16.mxu1 %v1179_v26 }
  0x35   :  { %1078 = vmatmul.mubr.bf16.gmra.mrb[8].mxu1 %v1186_v37 }
  0x36   :  { %1129 = vmatpush3.bf16.msra.mxu1 %v1179_v26  ;;  %1081 = vmatprep.mubr.bf16.mxu1 %v1187_v38 }
  0x37   :  { %1096 = vmatpush3.bf16.msra.mxu0 %v1181_v31  ;;  %1122 = vmatprep.subr.bf16.mxu1 %v1181_v31 }
  0x38   :  { %1097 = vmatprep.subr.bf16.mxu0 %v1183_v32 }
  0x3a   :  { %1050 = vmatmul.mubr.bf16.gmra.mrb[12].mxu0 %v1164_v33  ;;  %1130 = vmatpush3.bf16.msra.mxu1 %v1181_v31 }
  0x3b   :  { %1098 = vmatpush3.bf16.msra.mxu0 %v1183_v32  ;;  %1123 = vmatprep.subr.bf16.mxu1 %v1183_v32 }
  0x3c   :  { %1099 = vmatprep.subr.bf16.mxu0 %v1184_v35 }
  0x3d   :  { %1082 = vmatmul.mubr.bf16.gmra.mrb[12].mxu1 %v1188_v39 }
  0x3e   :  { %1131 = vmatpush3.bf16.msra.mxu1 %v1183_v32 }
  0x3f   :  { %1124 = vmatprep.subr.bf16.mxu1 %v1184_v35  ;;  %1100 = vmatpush3.bf16.msra.mxu0 %v1184_v35 }
  0x42   :  { %1132 = vmatpush3.bf16.msra.mxu1 %v1184_v35 }
  0xf5   :  { %v1039_v40 = vpop.f32.mrb[0].mxu0 }
  0xf6   :  { %v222_v41 = vpop.f32.mrb[1].mxu0 }
  0xf7   :  { %v1040_v42 = vpop.f32.mrb[2].mxu0 }
  0xf8   :  { %v337_v43 = vpack.c.bf16 %v1040_v42, %v1039_v40  ;;  %v225_v44 = vpop.f32.mrb[3].mxu0  ;;  %v1071_v53 = vpop.f32.mrb[0].mxu1 }
  0xf9   :  { %v336_v45 = vpack.c.bf16 %v225_v44, %v222_v41  ;;  %v522_v55 = vpop.f32.mrb[1].mxu1 }
  0xfa   :  { %v1072_v57 = vpop.f32.mrb[2].mxu1 }
  0xfb   :  { %1101 = vmatprep.mubr.bf16.mxu0 %v336_v45  ;;  %v525_v60 = vpop.f32.mrb[3].mxu1 }
  0xfc   :  { %1102 = vmatmul.mubr.bf16.vlgmr.msra.gmra.mrb[16].mxu0 %v337_v43 }
  0xfd   :  { %v1043_v46 = vpop.f32.mrb[4].mxu0 }
  0xfe   :  { %v238_v47 = vpop.f32.mrb[5].mxu0 }
  0xff   :  { %v1044_v48 = vpop.f32.mrb[6].mxu0 }
 0x100   :  { %v339_v49 = vpack.c.bf16 %v1044_v48, %v1043_v46  ;;  %v241_v50 = vpop.f32.mrb[7].mxu0  ;;  %v1075_v63 = vpop.f32.mrb[4].mxu1 }
 0x101   :  { %v338_v51 = vpack.c.bf16 %v241_v50, %v238_v47  ;;  %v538_v1 = vpop.f32.mrb[5].mxu1 }
 0x102   :  { %v1076_v3 = vpop.f32.mrb[6].mxu1 }
 0x103   :  { %1105 = vmatprep.mubr.bf16.mxu0 %v338_v51  ;;  %v541_v6 = vpop.f32.mrb[7].mxu1 }
 0x104   :  { %1106 = vmatmul.mubr.bf16.gmra.mrb[20].mxu0 %v339_v49 }
 0x105   :  { %v1047_v52 = vpop.f32.mrb[8].mxu0 }
 0x106   :  { %v254_v54 = vpop.f32.mrb[9].mxu0 }
 0x107   :  { %v1048_v56 = vpop.f32.mrb[10].mxu0 }
 0x108   :  { %v341_v58 = vpack.c.bf16 %v1048_v56, %v1047_v52  ;;  %v257_v59 = vpop.f32.mrb[11].mxu0 }
 0x109   :  { %v340_v61 = vpack.c.bf16 %v257_v59, %v254_v54 }
 0x10b   :  { %1109 = vmatprep.mubr.bf16.mxu1 %v340_v61 }
 0x10c   :  { %1110 = vmatmul.mubr.bf16.vlgmr.msra.gmra.mrb[8].mxu1 %v341_v58 }
 0x10d   :  { %v1051_v62 = vpop.f32.mrb[12].mxu0 }
 0x10e   :  { %v270_v0 = vpop.f32.mrb[13].mxu0 }
 0x10f   :  { %v1052_v2 = vpop.f32.mrb[14].mxu0 }
 0x110   :  { %v343_v4 = vpack.c.bf16 %v1052_v2, %v1051_v62  ;;  %v273_v5 = vpop.f32.mrb[15].mxu0 }
 0x111   :  { %v342_v7 = vpack.c.bf16 %v273_v5, %v270_v0 }
 0x113   :  { %1113 = vmatprep.mubr.bf16.mxu1 %v342_v7 }
 0x114   :  { %1114 = vmatmul.mubr.bf16.gmra.mrb[12].mxu1 %v343_v4 }
 0x1cf   :  { %v1103_v8 = vpop.f32.mrb[16].mxu0 }
 0x1d0   :  { %v676_v10 = vadd.f32 %v1103_v8, %v1071_v53  ;;  %v667_v11 = vpop.f32.mrb[17].mxu0 }
 0x1d1   :  { %v668_v12 = vadd.f32 %v667_v11, %v522_v55  ;;  %v1104_v13 = vpop.f32.mrb[18].mxu0 }
 0x1d2   :  { %v739_v14 = vadd.f32 %v1347_v9, %v676_v10  ;;  %v679_v15 = vadd.f32 %v1104_v13, %v1072_v57  ;;  %v670_v16 = vpop.f32.mrb[19].mxu0 }
 0x1d3   :  { %v737_v17 = vadd.f32 %v1347_v9, %v668_v12  ;;  %v671_v18 = vadd.f32 %v670_v16, %v525_v60 }
 0x1d4   :  { %v740_v19 = vadd.f32 %v1347_v9, %v679_v15  ;;  %v755_v21 = vmax.f32 %v739_v14, 0.0 }
 0x1d5   :  { %v738_v20 = vadd.f32 %v1347_v9, %v671_v18  ;;  %v753_v23 = vmax.f32 %v737_v17, 0.0 }
 0x1d6   :  { %v756_v22 = vmax.f32 %v740_v19, 0.0 }
 0x1d7   :  { %v754_v24 = vmax.f32 %v738_v20, 0.0  ;;  %v1107_v25 = vpop.f32.mrb[20].mxu0 }
 0x1d8   :  { %v934_v26 = vpack.c.bf16 %v756_v22, %v755_v21  ;;  %v692_v27 = vadd.f32 %v1107_v25, %v1075_v63  ;;  %v683_v28 = vpop.f32.mrb[21].mxu0 }
 0x1d9   :  { %v929_v29 = vpack.c.bf16 %v754_v24, %v753_v23  ;;  %v684_v30 = vadd.f32 %v683_v28, %v538_v1  ;;  %v1108_v31 = vpop.f32.mrb[22].mxu0 }
 0x1da   :  { %966 = vst [vmem:[%s1395_s6 + $0x8] sm:$0xff] %v934_v26   ;;  %v743_v32 = vadd.f32 %v1347_v9, %v692_v27  ;;  %v695_v33 = vadd.f32 %v1108_v31, %v1076_v3  ;;  %v686_v34 = vpop.f32.mrb[23].mxu0 }
 0x1db   :  { %930 = vst [vmem:[%s1395_s6] sm:$0xff] %v929_v29   ;;  %v741_v35 = vadd.f32 %v1347_v9, %v684_v30  ;;  %v687_v36 = vadd.f32 %v686_v34, %v541_v6 }
 0x1dc   :  { %v744_v37 = vadd.f32 %v1347_v9, %v695_v33  ;;  %v759_v39 = vmax.f32 %v743_v32, 0.0 }
 0x1dd   :  { %v742_v38 = vadd.f32 %v1347_v9, %v687_v36  ;;  %v757_v41 = vmax.f32 %v741_v35, 0.0 }
 0x1de   :  { %v760_v40 = vmax.f32 %v744_v37, 0.0 }
 0x1df   :  { %v758_v42 = vmax.f32 %v742_v38, 0.0  ;;  %v1111_v43 = vpop.f32.mrb[8].mxu1 }
 0x1e0   :  { %v944_v44 = vpack.c.bf16 %v760_v40, %v759_v39  ;;  %v747_v45 = vadd.f32 %v1111_v43, %v1347_v9  ;;  %v699_v46 = vpop.f32.mrb[9].mxu1 }
 0x1e1   :  { %v939_v47 = vpack.c.bf16 %v758_v42, %v757_v41  ;;  %v745_v48 = vadd.f32 %v1347_v9, %v699_v46  ;;  %v1112_v49 = vpop.f32.mrb[10].mxu1 }
 0x1e2   :  { %968 = vst [vmem:[%s1395_s6 + $0x18] sm:$0xff] %v944_v44   ;;  %v748_v50 = vadd.f32 %v1112_v49, %v1347_v9  ;;  %v702_v51 = vpop.f32.mrb[11].mxu1  ;;  %v763_v53 = vmax.f32 %v747_v45, 0.0 }
 0x1e3   :  { %967 = vst [vmem:[%s1395_s6 + $0x10] sm:$0xff] %v939_v47   ;;  %v746_v52 = vadd.f32 %v1347_v9, %v702_v51  ;;  %v761_v55 = vmax.f32 %v745_v48, 0.0 }
 0x1e4   :  { %v764_v54 = vmax.f32 %v748_v50, 0.0 }
 0x1e5   :  { %v762_v56 = vmax.f32 %v746_v52, 0.0 }
 0x1e6   :  { %v954_v57 = vpack.c.bf16 %v764_v54, %v763_v53 }
 0x1e7   :  { %v949_v58 = vpack.c.bf16 %v762_v56, %v761_v55  ;;  %v1115_v59 = vpop.f32.mrb[12].mxu1 }
 0x1e8   :  { %970 = vst [vmem:[%s1395_s6 + $0x28] sm:$0xff] %v954_v57   ;;  %v751_v60 = vadd.f32 %v1115_v59, %v1347_v9  ;;  %v715_v61 = vpop.f32.mrb[13].mxu1 }
 0x1e9   :  { %969 = vst [vmem:[%s1395_s6 + $0x20] sm:$0xff] %v949_v58   ;;  %v749_v62 = vadd.f32 %v1347_v9, %v715_v61  ;;  %v1116_v63 = vpop.f32.mrb[14].mxu1 }
 0x1ea   :  { %v752_v0 = vadd.f32 %v1116_v63, %v1347_v9  ;;  %v718_v1 = vpop.f32.mrb[15].mxu1  ;;  %v767_v3 = vmax.f32 %v751_v60, 0.0 }
 0x1eb   :  { %v750_v2 = vadd.f32 %v1347_v9, %v718_v1  ;;  %v765_v5 = vmax.f32 %v749_v62, 0.0 }
 0x1ec   :  { %v768_v4 = vmax.f32 %v752_v0, 0.0 }
 0x1ed   :  { %v766_v6 = vmax.f32 %v750_v2, 0.0 }
 0x1ee   :  { %v964_v7 = vpack.c.bf16 %v768_v4, %v767_v3 }
 0x1ef   :  { %v959_v8 = vpack.c.bf16 %v766_v6, %v765_v5 }
 0x1f0   :  { %972 = vst [vmem:[%s1395_s6 + $0x38] sm:$0xff] %v964_v7  }
 0x1f1   :  { %971 = vst [vmem:[%s1395_s6 + $0x30] sm:$0xff] %v959_v8  }

// kernel: neg.1
= control target key start
LH: loop header
LB: loop body
LE: loop exit
PB: predicated region body
PF: predicated region fallthrough
CT: control target
= control target key end

     0   :  { %s24_s0 = inlined_call_operand.vmem [shape: f32[40], index: 0, kind: input, shape index: {}]   ;;  %s25_s1 = inlined_call_operand.vmem [shape: f32[40], index: 1, kind: output, shape index: {}]  }
   0x1   :  { %v2_v0 = vld [vmem:[%s24_s0] sm:$0x1] }
   0x2   :  { %v5_v1 = vxor.u32 2147483648, %v2_v0 }
   0x4   :  { %7 = vst [vmem:[%s25_s1] sm:$0x1] %v5_v1 }

// kernel: mul.3
= control target key start
LH: loop header
LB: loop body
LE: loop exit
PB: predicated region body
PF: predicated region fallthrough
CT: control target
= control target key end

     0   :  { %s34_s0 = inlined_call_operand.vmem [shape: f32[40], index: 0, kind: input, shape index: {}]   ;;  %s35_s1 = inlined_call_operand.vmem [shape: f32[40], index: 1, kind: input, shape index: {}]   ;;  %s36_s2 = inlined_call_operand.vmem [shape: f32[40], index: 2, kind: output, shape index: {}]  }
   0x1   :  { %v3_v0 = vld [vmem:[%s34_s0] sm:$0x1] }
   0x2   :  { %v4_v1 = vld [vmem:[%s35_s1] sm:$0x1] }
   0x3   :  { %v7_v2 = vmul.f32 %v4_v1, %v3_v0 }
   0x5   :  { %9 = vst [vmem:[%s36_s2] sm:$0x1] %v7_v2 }

// kernel: l2x_gsg_forward.7
= control target key start
LH: loop header
LB: loop body
LE: loop exit
PB: predicated region body
PF: predicated region fallthrough
CT: control target
= control target key end

     0   :  { %v563_v1 = vmov 0.0   ;;  %vm564_vm0 = vmmov 0   ;;  %s725_s0 = inlined_call_operand.vmem [shape: bf16[2,128], index: 0, kind: input, shape index: {}]   ;;  %s726_s1 = inlined_call_operand.vmem [shape: bf16[128,128], index: 1, kind: input, shape index: {}]   ;;  %s727_s2 = inlined_call_operand.vmem [shape: bf16[128,128], index: 2, kind: input, shape index: {}]   ;;  %s728_s3 = inlined_call_operand.vmem [shape: f32[1,128], index: 3, kind: input, shape index: {}]   ;;  %s729_s4 = inlined_call_operand.vmem [shape: bf16[128,128], index: 4, kind: input, shape index: {}]   ;;  %s730_s5 = inlined_call_operand.vmem [shape: f32[1,128], index: 5, kind: input, shape index: {}]   ;;  %s731_s6 = inlined_call_operand.hbm [shape: f32[2,128], index: 6, kind: output, shape index: {}]  }
   0x1   :  { %v511_v0 = vld [vmem:[%s726_s1] sm:$0xff]   ;;  %448 = vmatprep.subr.bf16.mxu0 %v563_v1  ;;  %29 = vst [vmem:[#allocation2] sm:$0x3] %v563_v1  ;;  %468 = vmatprep.subr.bf16.mxu1 %v563_v1  ;;  %v512_v2 = vld [vmem:[%s726_s1 + $0x8] sm:$0xff]   ;;  %v513_v3 = vld [vmem:[%s726_s1 + $0x10] sm:$0xff]  }
   0x2   :  { %449 = vmatpush3.bf16.msra.mxu0 %v511_v0  ;;  %464 = vmatprep.mubr.msk.bf16.mxu0 %vm564_vm0, %v563_v1  ;;  %v519_v4 = vld [vmem:[%s727_s2] sm:$0xff]   ;;  %v514_v5 = vld [vmem:[%s726_s1 + $0x18] sm:$0xff]   ;;  %v520_v6 = vld [vmem:[%s727_s2 + $0x8] sm:$0xff]  }
   0x3   :  { %450 = vmatprep.subr.bf16.mxu0 %v563_v1  ;;  %484 = vmatprep.mubr.msk.bf16.mxu1 %vm564_vm0, %v563_v1  ;;  %v515_v7 = vld [vmem:[%s726_s1 + $0x20] sm:$0xff]   ;;  %v521_v8 = vld [vmem:[%s727_s2 + $0x10] sm:$0xff]   ;;  %v516_v9 = vld [vmem:[%s726_s1 + $0x28] sm:$0xff]  }
   0x4   :  { %469 = vmatpush3.bf16.msra.mxu1 %v519_v4  ;;  %v522_v10 = vld [vmem:[%s727_s2 + $0x18] sm:$0xff]  }
   0x5   :  { %470 = vmatprep.subr.bf16.mxu1 %v563_v1 }
   0x6   :  { %451 = vmatpush3.bf16.msra.mxu0 %v512_v2 }
   0x7   :  { %452 = vmatprep.subr.bf16.mxu0 %v563_v1 }
   0x8   :  { %471 = vmatpush3.bf16.msra.mxu1 %v520_v6 }
   0x9   :  { %472 = vmatprep.subr.bf16.mxu1 %v563_v1 }
   0xa   :  { %453 = vmatpush3.bf16.msra.mxu0 %v513_v3 }
   0xb   :  { %454 = vmatprep.subr.bf16.mxu0 %v563_v1 }
   0xc   :  { %473 = vmatpush3.bf16.msra.mxu1 %v521_v8 }
   0xd   :  { %474 = vmatprep.subr.bf16.mxu1 %v563_v1 }
   0xe   :  { %455 = vmatpush3.bf16.msra.mxu0 %v514_v5 }
   0xf   :  { %456 = vmatprep.subr.bf16.mxu0 %v563_v1 }
  0x12   :  { %457 = vmatpush3.bf16.msra.mxu0 %v515_v7 }
  0x13   :  { %458 = vmatprep.subr.bf16.mxu0 %v563_v1 }
  0x14   :  { %11 = vsyncpa [#allocation4], 0  ;;  %v517_v11 = vld [vmem:[%s726_s1 + $0x30] sm:$0xff]   ;;  %475 = vmatpush3.bf16.msra.mxu1 %v522_v10  ;;  %v523_v12 = vld [vmem:[%s727_s2 + $0x20] sm:$0xff]   ;;  %vm367_vm1 = vcmask 1041408  }
  0x15   :  { %476 = vmatprep.subr.bf16.mxu1 %v563_v1  ;;  %v518_v13 = vld [vmem:[%s726_s1 + $0x38] sm:$0xff]   ;;  %v31_v14 = vld [vmem:[%s725_s0] sm:$0x1]  ;;  %v524_v15 = vld [vmem:[%s727_s2 + $0x28] sm:$0xff]  }
  0x16   :  { %459 = vmatpush3.bf16.msra.mxu0 %v516_v9  ;;  %v525_v16 = vld [vmem:[%s727_s2 + $0x30] sm:$0xff]   ;;  %v526_v17 = vld [vmem:[%s727_s2 + $0x38] sm:$0xff]   ;;  %v527_v18 = vld [vmem:[%s729_s4] sm:$0xff]  }
  0x17   :  { %460 = vmatprep.subr.bf16.mxu0 %v563_v1  ;;  %v528_v19 = vld [vmem:[%s729_s4 + $0x8] sm:$0xff]   ;;  %v529_v20 = vld [vmem:[%s729_s4 + $0x10] sm:$0xff]   ;;  %v530_v21 = vld [vmem:[%s729_s4 + $0x18] sm:$0xff]  }
  0x18   :  { %477 = vmatpush3.bf16.msra.mxu1 %v523_v12  ;;  %v531_v22 = vld [vmem:[%s729_s4 + $0x20] sm:$0xff]   ;;  %v532_v23 = vld [vmem:[%s729_s4 + $0x28] sm:$0xff]   ;;  %v533_v32 = vld [vmem:[%s729_s4 + $0x30] sm:$0xff]  }
  0x19   :  { %478 = vmatprep.subr.bf16.mxu1 %v563_v1  ;;  %v30_v24 = vld [vmem:[#allocation2] sm:$0x3]  ;;  %v534_v33 = vld [vmem:[%s729_s4 + $0x38] sm:$0xff]  }
  0x1a   :  { %461 = vmatpush3.bf16.msra.mxu0 %v517_v11  ;;  %v403_v34 = vld [vmem:[%s728_s3] ss:$0 sm:$0xff]  ;;  %s565_s3 = smov [#allocation3]  }
  0x1b   :  { %462 = vmatprep.subr.bf16.mxu0 %v563_v1  ;;  %v412_v42 = vld [vmem:[%s730_s5] ss:$0 sm:$0xff]  ;;  %s387_s4 = sshll.u32 %s565_s3, 4  ;;  %s388_s4 = int_to_ptr.vmem [resolvable:$true] %s387_s4 }
  0x1c   :  { %479 = vmatpush3.bf16.msra.mxu1 %v524_v15  ;;  %s539_s5 = scalar_lea.vmem %s388_s4, 32  ;;  %p544_p1 = scmp.lt.s32.totalorder %s388_s4, %s388_s4 }
  0x1d   :  { %480 = vmatprep.subr.bf16.mxu1 %v563_v1  ;;  %p540_p0 = scmp.ne.s32.totalorder %s388_s4, %s539_s5  ;;  %p545_p2 = scmp.lt.s32.totalorder %s539_s5, %s539_s5 }
  0x1e   :  { %463 = vmatpush3.bf16.msra.mxu0 %v518_v13 }
  0x1f   :  { %488 = vmatprep.subr.bf16.mxu0 %v563_v1  ;;  %p546_p3 = por %p545_p2, %p544_p1 }
  0x20   :  { %481 = vmatpush3.bf16.msra.mxu1 %v525_v16 }
  0x21   :  { %465 = vmatmul.mubr.bf16.vlgmr.msra.gmra.mrb[0].mxu0 %v31_v14  ;;  %482 = vmatprep.subr.bf16.mxu1 %v563_v1  ;;  %p547_p4 = pnand %p546_p3, %p540_p0 }
  0x22   :  { %504 = vmatprep.mubr.msk.bf16.mxu0 %vm564_vm0, %v563_v1  ;;  %489 = vmatpush3.bf16.msra.mxu0 %v527_v18 }
  0x23   :  { %490 = vmatprep.subr.bf16.mxu0 %v563_v1 }
  0x24   :  { %483 = vmatpush3.bf16.msra.mxu1 %v526_v17 }
  0x26   :  { %491 = vmatpush3.bf16.msra.mxu0 %v528_v19 }
  0x27   :  { %492 = vmatprep.subr.bf16.mxu0 %v563_v1 }
  0x2a   :  { %493 = vmatpush3.bf16.msra.mxu0 %v529_v20 }
  0x2b   :  { %494 = vmatprep.subr.bf16.mxu0 %v563_v1 }
  0x2e   :  { %495 = vmatpush3.bf16.msra.mxu0 %v530_v21 }
  0x2f   :  { %496 = vmatprep.subr.bf16.mxu0 %v563_v1 }
  0x32   :  { %497 = vmatpush3.bf16.msra.mxu0 %v531_v22 }
  0x33   :  { %498 = vmatprep.subr.bf16.mxu0 %v563_v1 }
  0x36   :  { %499 = vmatpush3.bf16.msra.mxu0 %v532_v23 }
  0x37   :  { %500 = vmatprep.subr.bf16.mxu0 %v563_v1 }
  0x3a   :  { %501 = vmatpush3.bf16.msra.mxu0 %v533_v32 }
  0x3b   :  { %502 = vmatprep.subr.bf16.mxu0 %v563_v1 }
  0x3e   :  { %503 = vmatpush3.bf16.msra.mxu0 %v534_v33 }
  0xf4   :  { %v130_v25 = vpop.f32.mrb[0].mxu0 }
  0xf5   :  { %v136_v26 = vadd.f32 %v130_v25, %v30_v24  ;;  %v466_v27 = vpop.f32.mrb[1].mxu0 }
  0xf6   :  { %v133_v28 = vpop.f32.mrb[2].mxu0 }
  0xf7   :  { %137 = vst [vmem:[#allocation2] sm:$0x3] %v136_v26  ;;  %v467_v29 = vpop.f32.mrb[3].mxu0 }
  0xfe   :  { %v141_v30 = vld [vmem:[#allocation2] sm:$0x3] }
  0xff   :  { %v142_v31 = vpack.c.bf16 %v141_v30, %v141_v30 }
 0x101   :  { %485 = vmatmul.mubr.bf16.vlgmr.msra.gmra.mrb[0].mxu1 %v142_v31 }
 0x1d4   :  { %v248_v35 = vpop.f32.mrb[0].mxu1 }
 0x1d5   :  { %v249_v36 = vadd.f32 %v403_v34, %v248_v35  ;;  %v486_v37 = vpop.f32.mrb[1].mxu1 }
 0x1d6   :  { %v251_v38 = vpop.f32.mrb[2].mxu1 }
 0x1d7   :  { %v254_v39 = vmax.f32 %v249_v36, 0.0  ;;  %v487_v40 = vpop.f32.mrb[3].mxu1 }
 0x1d9   :  { %v255_v41 = vpack.c.bf16 %v254_v39, %v254_v39 }
 0x1db   :  { %505 = vmatmul.mubr.bf16.vlgmr.msra.gmra.mrb[4].mxu0 %v255_v41 }
 0x2ae   :  { %v361_v43 = vpop.f32.mrb[4].mxu0 }
 0x2af   :  { %v362_v44 = vadd.f32 %v412_v42, %v361_v43  ;;  %v506_v45 = vpop.f32.mrb[5].mxu0 }
 0x2b0   :  { %v364_v46 = vpop.f32.mrb[6].mxu0 }
 0x2b1   :  { %v507_v47 = vpop.f32.mrb[7].mxu0  ;;  %v368_v48 = vsel %vm367_vm1, %v362_v44, -inf }
 0x2b2   :  { %369 = vmax.xlane.f32.xlu0 %v368_v48 }
 0x33f   :  { %v370_v49 = vpop.xlane.xlu0 %369 }
 0x340   :  { %v371_v50 = vsub.f32 %v362_v44, %v370_v49 }
 0x342   :  { %v372_v51 = vmul.f32 1.442695, %v371_v50 }
 0x344   :  { %535 = vpow2.f32 %v372_v51 }
 0x34e   :  { %v536_v52 = vpop.eup %535 }
 0x34f   :  { %v374_v53 = vsel %vm367_vm1, %v536_v52, 0.0 }
 0x350   :  { %375 = vadd.xlane.f32.xlu0 %v374_v53 }
 0x3dd   :  { %v376_v54 = vpop.xlane.xlu0 %375 }
 0x3de   :  { %537 = vlog2.f32 %v376_v54 }
 0x3e8   :  { %v538_v55 = vpop.eup %537 }
 0x3e9   :  { %v378_v56 = vmul.f32 0.6931472, %v538_v55 }
 0x3eb   :  { %v379_v57 = vsub.f32 %v371_v50, %v378_v56 }
 0x3ed   :  { %380 = vst [vmem:[#allocation3] sm:$0x3] %v379_v57 }
 0x3ee   :  { %550 = shalt.err (!%p547_p4)
}
 0x3ef   :  { %s551_s26 = scalar_lea.hbm %s731_s6, 32 }
 0x3f0   :  { %p552_p5 = scmp.ne.s32.totalorder %s731_s6, %s551_s26  ;;  %p555_p6 = scmp.lt.u32.totalorder %s551_s26, %s731_s6 }
 0x3f2   :  { %p557_p7 = pnand %p555_p6, %p552_p5 }
 0x3f4   :  { %560 = shalt.err (!%p557_p7)
}
 0x3f5   :  { %390 = dma.vmem_to_hbm [thread:$0]  %s388_s4, 32, %s731_s6, [#allocation4]  }
 0x3f6   :  { %561 = dma.done.wait [#allocation4], 32  }
 0x3f7   :  { %562 = vsyncadd [#allocation4], 4294967264 }
 0x3f8   :  { %394 = vsyncpa [#allocation4], 1 }

// kernel: l2x_gsg_forward.6
= control target key start
LH: loop header
LB: loop body
LE: loop exit
PB: predicated region body
PF: predicated region fallthrough
CT: control target
= control target key end

     0   :  { %s2503_s18 = smov 0   ;;  %s2505_s19 = smov 0   ;;  %s2804_s0 = inlined_call_operand.vmem [shape: bf16[128,128], index: 0, kind: input, shape index: {}]   ;;  %s2805_s1 = inlined_call_operand.vmem [shape: bf16[128,128], index: 1, kind: input, shape index: {}]   ;;  %s2806_s2 = inlined_call_operand.vmem [shape: bf16[2,128,128], index: 2, kind: input, shape index: {}]   ;;  %s2807_s3 = inlined_call_operand.vmem [shape: bf16[2,128,128], index: 3, kind: input, shape index: {}]   ;;  %s2808_s4 = inlined_call_operand.vmem [shape: f32[2,1,128], index: 4, kind: input, shape index: {}]   ;;  %s2809_s5 = inlined_call_operand.vmem [shape: bf16[128,128], index: 5, kind: output, shape index: {}]  }
   0x1   :  { %s2507_s20 = smov 0  }
   0x2 LB: > { %s34_s21 = sadd.s32 1, %s2466_s19  ;;  %p1827_p0 = scmp.ge.s32.totalorder %s2470_s20, 1  ;;  %s2470_s20 = sphi %s2507_s20, %s15_s20   ;;  %s2466_s19 = sphi %s2505_s19, %s2811_s19   ;;  %s2462_s18 = sphi %s2503_s18, %s2810_s18  }
   0x3   : > { %p36_p1 = scmp.ge.s32.totalorder %s34_s21, 2  ;;  %p240_p2 = scmp.lt.s32.totalorder %s2470_s20, 3 }
   0x5   : > { %s2813_s21 = smov (%p36_p1, %s34_s21), 0  ;;  %p241_p3 = pnand %p1827_p0, %p240_p2 }
   0x6   : > { %p293_p4 = scmp.lt.s32.totalorder (!%p241_p3), %s2462_s18, 1  ;;  %s314_s22 = ssub.s32 (!%p241_p3), 0, %s2462_s18 }
   0x7   : > { %244 = sbr.rel (%p241_p3) target bundleno = 1291 (0x50b), region = 40  ;;  %p325_p5 = scmp.eq.s32.totalorder (!%p241_p3), %s2462_s18, 0 }
   0x8   : > { %p313_p6 = scmp.lt.s32.totalorder (!%p241_p3), %s2462_s18, 0  ;;  %s1832_s24 = smin.u32 (!%p241_p3), %s2462_s18, %s314_s22 }
   0x9   : > { %s316_s10 = sand.u32 (!%p241_p3), 1, %s1832_s24  }
   0xa   : > { %s317_s11 = ssub.s32 (!%p241_p3), 0, %s316_s10 }
   0xe   : > { %s294_s23 = scalar_select %p293_p4, %s2462_s18, 1 }
   0xf   : > { %s2815_s11 = smov (!%p313_p6, %s317_s11), %s316_s10  ;;  %333 = sbr.rel (!%p325_p5) target bundleno = 22 (0x16), region = 44 }
  0x10   : > { %s1926_s25 = sshll.u32 %s294_s23, 6  ;;  %s2524_s28 = scalar_lea.vmem %s2808_s4, %s294_s23  ;;  %v2400_v0 = vld [vmem:[%s2805_s1] sm:$0xff] (%p325_p5)   ;;  %v2401_v1 = vld [vmem:[%s2805_s1 + $0x8] sm:$0xff] (%p325_p5)   ;;  %v2402_v2 = vld [vmem:[%s2805_s1 + $0x10] sm:$0xff] (%p325_p5)  }
  0x11   : > { %s2529_s6 = scalar_lea.vmem %s2806_s2, %s1926_s25  ;;  %s2534_s9 = scalar_lea.vmem %s2807_s3, %s1926_s25  ;;  %398 = vst [vmem:[#allocation3] sm:$0xff] (%p325_p5), %v2400_v0  ;;  %399 = vst [vmem:[#allocation3 + $0x8] sm:$0xff] (%p325_p5), %v2401_v1  ;;  %v2403_v3 = vld [vmem:[%s2805_s1 + $0x18] sm:$0xff] (%p325_p5)   ;;  %v2404_v4 = vld [vmem:[%s2805_s1 + $0x20] sm:$0xff] (%p325_p5)  }
  0x12   : > { %p1834_p7 = scmp.lt.s32.totalorder %s2815_s11, 0  ;;  %s323_s12 = sadd.s32 2, %s2815_s11  ;;  %400 = vst [vmem:[#allocation3 + $0x10] sm:$0xff] (%p325_p5), %v2402_v2  ;;  %401 = vst [vmem:[#allocation3 + $0x18] sm:$0xff] (%p325_p5), %v2403_v3  ;;  %v2405_v5 = vld [vmem:[%s2805_s1 + $0x28] sm:$0xff] (%p325_p5)   ;;  %v2406_v6 = vld [vmem:[%s2805_s1 + $0x30] sm:$0xff] (%p325_p5)  }
  0x13   : > { %402 = vst [vmem:[#allocation3 + $0x20] sm:$0xff] (%p325_p5), %v2404_v4  ;;  %403 = vst [vmem:[#allocation3 + $0x28] sm:$0xff] (%p325_p5), %v2405_v5  ;;  %v2407_v7 = vld [vmem:[%s2805_s1 + $0x38] sm:$0xff] (%p325_p5)  }
  0x14   : > { %s2817_s12 = smov (!%p1834_p7, %s323_s12), %s2815_s11  ;;  %404 = vst [vmem:[#allocation3 + $0x30] sm:$0xff] (%p325_p5), %v2406_v6  ;;  %405 = vst [vmem:[#allocation3 + $0x38] sm:$0xff] (%p325_p5), %v2407_v7 }
  0x16 PF: > { %v2472_v8 = vmov 0.0   ;;  %p1844_p8 = scmp.ne.s32.totalorder %s2817_s12, 0 }
  0x17   : > { %409 = vst [vmem:[#allocation2] sm:$0xff] %v2472_v8  ;;  %410 = vst [vmem:[#allocation2 + $0x8] sm:$0xff] %v2472_v8  ;;  %v2408_v12 = vld [vmem:[%s2804_s0] sm:$0xff] (!%p1844_p8)   ;;  %v2410_v19 = vld [vmem:[%s2804_s0 + $0x8] sm:$0xff] (!%p1844_p8)  }
  0x18   : > { %411 = vst [vmem:[#allocation2 + $0x10] sm:$0xff] %v2472_v8  ;;  %412 = vst [vmem:[#allocation2 + $0x18] sm:$0xff] %v2472_v8  ;;  %429 = sbr.rel (%p1844_p8) target bundleno = 283 (0x11b), region = 52  ;;  %v466_v9 = vld [vmem:[#allocation3] sm:$0xff] (!%p1844_p8)  ;;  %v467_v10 = vld [vmem:[#allocation3 + $0x8] sm:$0xff] (!%p1844_p8)  ;;  %2151 = vmatprep.mubr.bf16.mxu0 (!%p1844_p8), %v2408_v12 }
  0x19   : > { %413 = vst [vmem:[#allocation2 + $0x20] sm:$0xff] %v2472_v8  ;;  %414 = vst [vmem:[#allocation2 + $0x28] sm:$0xff] %v2472_v8  ;;  %2135 = vmatprep.subr.bf16.mxu0 (!%p1844_p8), %v466_v9  ;;  %2295 = vmatprep.subr.bf16.mxu1 (!%p1844_p8), %v466_v9  ;;  %v468_v11 = vld [vmem:[#allocation3 + $0x10] sm:$0xff] (!%p1844_p8)  ;;  %v2409_v13 = vld [vmem:[%s2804_s0 + $0x20] sm:$0xff] (!%p1844_p8)  }
  0x1a   : > { %415 = vst [vmem:[#allocation2 + $0x30] sm:$0xff] %v2472_v8  ;;  %416 = vst [vmem:[#allocation2 + $0x38] sm:$0xff] %v2472_v8  ;;  %2136 = vmatpush3.bf16.msra.mxu0 (!%p1844_p8), %v466_v9  ;;  %2303 = vmatpush3.bf16.msra.mxu1 (!%p1844_p8), %v466_v9  ;;  %v469_v14 = vld [vmem:[#allocation3 + $0x18] sm:$0xff] (!%p1844_p8)  ;;  %v470_v15 = vld [vmem:[#allocation3 + $0x20] sm:$0xff] (!%p1844_p8) }
  0x1b   : > { %417 = vst [vmem:[#allocation2 + $0x40] sm:$0xff] %v2472_v8  ;;  %418 = vst [vmem:[#allocation2 + $0x48] sm:$0xff] %v2472_v8  ;;  %2137 = vmatprep.subr.bf16.mxu0 (!%p1844_p8), %v467_v10  ;;  %2296 = vmatprep.subr.bf16.mxu1 (!%p1844_p8), %v467_v10  ;;  %v471_v16 = vld [vmem:[#allocation3 + $0x28] sm:$0xff] (!%p1844_p8)  ;;  %v472_v17 = vld [vmem:[#allocation3 + $0x30] sm:$0xff] (!%p1844_p8) }
  0x1c   : > { %419 = vst [vmem:[#allocation2 + $0x50] sm:$0xff] %v2472_v8  ;;  %420 = vst [vmem:[#allocation2 + $0x58] sm:$0xff] %v2472_v8  ;;  %2159 = vmatprep.mubr.bf16.mxu1 (!%p1844_p8), %v2409_v13  ;;  %v473_v18 = vld [vmem:[#allocation3 + $0x38] sm:$0xff] (!%p1844_p8)  ;;  %v2411_v20 = vld [vmem:[%s2804_s0 + $0x28] sm:$0xff] (!%p1844_p8)  }
  0x1d   : > { %421 = vst [vmem:[#allocation2 + $0x60] sm:$0xff] %v2472_v8  ;;  %422 = vst [vmem:[#allocation2 + $0x68] sm:$0xff] %v2472_v8  ;;  %v2412_v21 = vld [vmem:[%s2804_s0 + $0x10] sm:$0xff] (!%p1844_p8)   ;;  %v2414_v23 = vld [vmem:[%s2804_s0 + $0x18] sm:$0xff] (!%p1844_p8)  }
  0x1e   : > { %423 = vst [vmem:[#allocation2 + $0x70] sm:$0xff] %v2472_v8  ;;  %424 = vst [vmem:[#allocation2 + $0x78] sm:$0xff] %v2472_v8  ;;  %2138 = vmatpush3.bf16.msra.mxu0 (!%p1844_p8), %v467_v10  ;;  %2304 = vmatpush3.bf16.msra.mxu1 (!%p1844_p8), %v467_v10  ;;  %v2413_v22 = vld [vmem:[%s2804_s0 + $0x30] sm:$0xff] (!%p1844_p8)   ;;  %v2415_v24 = vld [vmem:[%s2804_s0 + $0x38] sm:$0xff] (!%p1844_p8)  }
  0x1f   : > { %2139 = vmatprep.subr.bf16.mxu0 %v468_v11  ;;  %2297 = vmatprep.subr.bf16.mxu1 %v468_v11  ;;  %v432_v25 = vld [vmem:[#allocation2 + $0x10] sm:$0xff]  ;;  %v430_v27 = vld [vmem:[#allocation2] sm:$0xff]  ;;  %v433_v31 = vld [vmem:[#allocation2 + $0x18] sm:$0xff] }
  0x20   : > { %v431_v37 = vld [vmem:[#allocation2 + $0x8] sm:$0xff]  ;;  %v434_v51 = vld [vmem:[#allocation2 + $0x20] sm:$0xff] }
  0x21   : > { %v436_v49 = vld [vmem:[#allocation2 + $0x30] sm:$0xff]  ;;  %v437_v55 = vld [vmem:[#allocation2 + $0x38] sm:$0xff]  ;;  %v435_v61 = vld [vmem:[#allocation2 + $0x28] sm:$0xff] }
  0x22   : > { %2140 = vmatpush3.bf16.msra.mxu0 %v468_v11  ;;  %2305 = vmatpush3.bf16.msra.mxu1 %v468_v11  ;;  %v438_v28 = vld [vmem:[#allocation2 + $0x40] sm:$0xff]  ;;  %v439_v38 = vld [vmem:[#allocation2 + $0x48] sm:$0xff] }
  0x23   : > { %2141 = vmatprep.subr.bf16.mxu0 %v469_v14  ;;  %2298 = vmatprep.subr.bf16.mxu1 %v469_v14  ;;  %v440_v26 = vld [vmem:[#allocation2 + $0x50] sm:$0xff]  ;;  %v441_v32 = vld [vmem:[#allocation2 + $0x58] sm:$0xff] }
  0x24   : > { %v442_v52 = vld [vmem:[#allocation2 + $0x60] sm:$0xff]  ;;  %v443_v62 = vld [vmem:[#allocation2 + $0x68] sm:$0xff] }
  0x25   : > { %v444_v50 = vld [vmem:[#allocation2 + $0x70] sm:$0xff]  ;;  %v445_v56 = vld [vmem:[#allocation2 + $0x78] sm:$0xff] }
  0x26   : > { %2142 = vmatpush3.bf16.msra.mxu0 %v469_v14  ;;  %2306 = vmatpush3.bf16.msra.mxu1 %v469_v14 }
  0x27   : > { %2143 = vmatprep.subr.bf16.mxu0 %v470_v15  ;;  %2299 = vmatprep.subr.bf16.mxu1 %v470_v15 }
  0x2a   : > { %2144 = vmatpush3.bf16.msra.mxu0 %v470_v15  ;;  %2307 = vmatpush3.bf16.msra.mxu1 %v470_v15 }
  0x2b   : > { %2145 = vmatprep.subr.bf16.mxu0 %v471_v16  ;;  %2300 = vmatprep.subr.bf16.mxu1 %v471_v16 }
  0x2e   : > { %2146 = vmatpush3.bf16.msra.mxu0 %v471_v16  ;;  %2308 = vmatpush3.bf16.msra.mxu1 %v471_v16 }
  0x2f   : > { %2147 = vmatprep.subr.bf16.mxu0 %v472_v17  ;;  %2301 = vmatprep.subr.bf16.mxu1 %v472_v17 }
  0x32   : > { %2148 = vmatpush3.bf16.msra.mxu0 %v472_v17  ;;  %2309 = vmatpush3.bf16.msra.mxu1 %v472_v17 }
  0x33   : > { %2149 = vmatprep.subr.bf16.mxu0 %v473_v18  ;;  %2302 = vmatprep.subr.bf16.mxu1 %v473_v18 }
  0x36   : > { %2150 = vmatpush3.bf16.msra.mxu0 %v473_v18  ;;  %2310 = vmatpush3.bf16.msra.mxu1 %v473_v18 }
  0x39   : > { %2152 = vmatmul.mubr.bf16.vlgmr.msra.gmra.mrb[0].mxu0 %v2410_v19  ;;  %2160 = vmatmul.mubr.bf16.vlgmr.msra.gmra.mrb[0].mxu1 %v2411_v20 }
  0x3a   : > { %2155 = vmatprep.mubr.bf16.mxu0 %v2412_v21  ;;  %2163 = vmatprep.mubr.bf16.mxu1 %v2413_v22 }
  0x41   : > { %2156 = vmatmul.mubr.bf16.gmra.mrb[4].mxu0 %v2414_v23  ;;  %2164 = vmatmul.mubr.bf16.gmra.mrb[4].mxu1 %v2415_v24 }
 0x10c   : > { %v2153_v29 = vpop.f32.mrb[0].mxu0  ;;  %v2161_v30 = vpop.f32.mrb[0].mxu1 }
 0x10d   : > { %v621_v33 = vadd.f32 %v2153_v29, %v432_v25  ;;  %v629_v34 = vadd.f32 %v2161_v30, %v440_v26  ;;  %v556_v35 = vpop.f32.mrb[1].mxu0  ;;  %v588_v36 = vpop.f32.mrb[1].mxu1 }
 0x10e   : > { %v619_v39 = vadd.f32 %v556_v35, %v430_v27  ;;  %v627_v40 = vadd.f32 %v588_v36, %v438_v28  ;;  %v2154_v41 = vpop.f32.mrb[2].mxu0  ;;  %v2162_v42 = vpop.f32.mrb[2].mxu1 }
 0x10f   : > { %637 = vst [vmem:[#allocation2 + $0x10] sm:$0xff] %v621_v33  ;;  %645 = vst [vmem:[#allocation2 + $0x50] sm:$0xff] %v629_v34  ;;  %v622_v43 = vadd.f32 %v2154_v41, %v433_v31  ;;  %v630_v44 = vadd.f32 %v2162_v42, %v441_v32  ;;  %v559_v45 = vpop.f32.mrb[3].mxu0  ;;  %v591_v46 = vpop.f32.mrb[3].mxu1 }
 0x110   : > { %635 = vst [vmem:[#allocation2] sm:$0xff] %v619_v39  ;;  %643 = vst [vmem:[#allocation2 + $0x40] sm:$0xff] %v627_v40  ;;  %v620_v47 = vadd.f32 %v559_v45, %v431_v37  ;;  %v628_v48 = vadd.f32 %v591_v46, %v439_v38 }
 0x111   : > { %638 = vst [vmem:[#allocation2 + $0x18] sm:$0xff] %v622_v43  ;;  %646 = vst [vmem:[#allocation2 + $0x58] sm:$0xff] %v630_v44 }
 0x112   : > { %636 = vst [vmem:[#allocation2 + $0x8] sm:$0xff] %v620_v47  ;;  %644 = vst [vmem:[#allocation2 + $0x48] sm:$0xff] %v628_v48 }
 0x114   : > { %v2157_v53 = vpop.f32.mrb[4].mxu0  ;;  %v2165_v54 = vpop.f32.mrb[4].mxu1 }
 0x115   : > { %v625_v57 = vadd.f32 %v2157_v53, %v436_v49  ;;  %v633_v58 = vadd.f32 %v2165_v54, %v444_v50  ;;  %v572_v59 = vpop.f32.mrb[5].mxu0  ;;  %v604_v60 = vpop.f32.mrb[5].mxu1 }
 0x116   : > { %v623_v63 = vadd.f32 %v572_v59, %v434_v51  ;;  %v631_v0 = vadd.f32 %v604_v60, %v442_v52  ;;  %v2158_v1 = vpop.f32.mrb[6].mxu0  ;;  %v2166_v2 = vpop.f32.mrb[6].mxu1 }
 0x117   : > { %641 = vst [vmem:[#allocation2 + $0x30] sm:$0xff] %v625_v57  ;;  %649 = vst [vmem:[#allocation2 + $0x70] sm:$0xff] %v633_v58  ;;  %v626_v3 = vadd.f32 %v2158_v1, %v437_v55  ;;  %v634_v4 = vadd.f32 %v2166_v2, %v445_v56  ;;  %v575_v5 = vpop.f32.mrb[7].mxu0  ;;  %v607_v6 = vpop.f32.mrb[7].mxu1 }
 0x118   : > { %639 = vst [vmem:[#allocation2 + $0x20] sm:$0xff] %v623_v63  ;;  %647 = vst [vmem:[#allocation2 + $0x60] sm:$0xff] %v631_v0  ;;  %v624_v7 = vadd.f32 %v575_v5, %v435_v61  ;;  %v632_v8 = vadd.f32 %v607_v6, %v443_v62 }
 0x119   : > { %642 = vst [vmem:[#allocation2 + $0x38] sm:$0xff] %v626_v3  ;;  %650 = vst [vmem:[#allocation2 + $0x78] sm:$0xff] %v634_v4 }
 0x11a   : > { %640 = vst [vmem:[#allocation2 + $0x28] sm:$0xff] %v624_v7  ;;  %648 = vst [vmem:[#allocation2 + $0x68] sm:$0xff] %v632_v8 }
 0x11b PF: > { %p1853_p9 = scmp.ne.s32.totalorder %s2817_s12, 1 }
 0x11c   : > { %v691_v9 = vld [vmem:[#allocation4] sm:$0xff] (!%p1853_p9)  ;;  %v692_v10 = vld [vmem:[#allocation4 + $0x8] sm:$0xff] (!%p1853_p9)  ;;  %v693_v11 = vld [vmem:[#allocation4 + $0x10] sm:$0xff] (!%p1853_p9) }
 0x11d   : > { %654 = sbr.rel (%p1853_p9) target bundleno = 543 (0x21f), region = 56  ;;  %2167 = vmatprep.subr.bf16.mxu0 (!%p1853_p9), %v691_v9  ;;  %2311 = vmatprep.subr.bf16.mxu1 (!%p1853_p9), %v691_v9  ;;  %v2416_v12 = vld [vmem:[%s2804_s0] sm:$0xff] (!%p1853_p9)   ;;  %v694_v14 = vld [vmem:[#allocation4 + $0x18] sm:$0xff] (!%p1853_p9)  ;;  %v696_v16 = vld [vmem:[#allocation4 + $0x28] sm:$0xff] (!%p1853_p9) }
 0x11e   : > { %2168 = vmatpush3.bf16.msra.mxu0 (!%p1853_p9), %v691_v9  ;;  %2319 = vmatpush3.bf16.msra.mxu1 (!%p1853_p9), %v691_v9  ;;  %v2417_v13 = vld [vmem:[%s2804_s0 + $0x20] sm:$0xff] (!%p1853_p9)   ;;  %v697_v17 = vld [vmem:[#allocation4 + $0x30] sm:$0xff] (!%p1853_p9)  ;;  %v698_v18 = vld [vmem:[#allocation4 + $0x38] sm:$0xff] (!%p1853_p9) }
 0x11f   : > { %2169 = vmatprep.subr.bf16.mxu0 (!%p1853_p9), %v692_v10  ;;  %2312 = vmatprep.subr.bf16.mxu1 (!%p1853_p9), %v692_v10  ;;  %v695_v15 = vld [vmem:[#allocation4 + $0x20] sm:$0xff] (!%p1853_p9)  ;;  %v2418_v19 = vld [vmem:[%s2804_s0 + $0x8] sm:$0xff] (!%p1853_p9)   ;;  %v2420_v21 = vld [vmem:[%s2804_s0 + $0x10] sm:$0xff] (!%p1853_p9)  }
 0x120   : > { %2183 = vmatprep.mubr.bf16.mxu0 (!%p1853_p9), %v2416_v12  ;;  %2191 = vmatprep.mubr.bf16.mxu1 (!%p1853_p9), %v2417_v13  ;;  %v2419_v20 = vld [vmem:[%s2804_s0 + $0x28] sm:$0xff] (!%p1853_p9)   ;;  %v2421_v22 = vld [vmem:[%s2804_s0 + $0x30] sm:$0xff] (!%p1853_p9)   ;;  %v2422_v23 = vld [vmem:[%s2804_s0 + $0x18] sm:$0xff] (!%p1853_p9)  }
 0x121   : > { %v2423_v24 = vld [vmem:[%s2804_s0 + $0x38] sm:$0xff] (!%p1853_p9)   ;;  %v657_v25 = vld [vmem:[#allocation2 + $0x10] sm:$0xff] (!%p1853_p9)  ;;  %v655_v27 = vld [vmem:[#allocation2] sm:$0xff] (!%p1853_p9) }
 0x122   : > { %2170 = vmatpush3.bf16.msra.mxu0 (!%p1853_p9), %v692_v10  ;;  %2320 = vmatpush3.bf16.msra.mxu1 (!%p1853_p9), %v692_v10  ;;  %v665_v26 = vld [vmem:[#allocation2 + $0x50] sm:$0xff] (!%p1853_p9)  ;;  %v663_v28 = vld [vmem:[#allocation2 + $0x40] sm:$0xff] (!%p1853_p9)  ;;  %v658_v31 = vld [vmem:[#allocation2 + $0x18] sm:$0xff] (!%p1853_p9) }
 0x123   : > { %2171 = vmatprep.subr.bf16.mxu0 (!%p1853_p9), %v693_v11  ;;  %2313 = vmatprep.subr.bf16.mxu1 (!%p1853_p9), %v693_v11  ;;  %v666_v32 = vld [vmem:[#allocation2 + $0x58] sm:$0xff] (!%p1853_p9)  ;;  %v656_v37 = vld [vmem:[#allocation2 + $0x8] sm:$0xff] (!%p1853_p9)  ;;  %v661_v49 = vld [vmem:[#allocation2 + $0x30] sm:$0xff] (!%p1853_p9) }
 0x124   : > { %v664_v38 = vld [vmem:[#allocation2 + $0x48] sm:$0xff]  ;;  %v669_v50 = vld [vmem:[#allocation2 + $0x70] sm:$0xff]  ;;  %v659_v51 = vld [vmem:[#allocation2 + $0x20] sm:$0xff] }
 0x125   : > { %v667_v52 = vld [vmem:[#allocation2 + $0x60] sm:$0xff]  ;;  %v662_v55 = vld [vmem:[#allocation2 + $0x38] sm:$0xff]  ;;  %v660_v61 = vld [vmem:[#allocation2 + $0x28] sm:$0xff] }
 0x126   : > { %2172 = vmatpush3.bf16.msra.mxu0 %v693_v11  ;;  %2321 = vmatpush3.bf16.msra.mxu1 %v693_v11  ;;  %v670_v56 = vld [vmem:[#allocation2 + $0x78] sm:$0xff]  ;;  %v668_v62 = vld [vmem:[#allocation2 + $0x68] sm:$0xff] }
 0x127   : > { %2173 = vmatprep.subr.bf16.mxu0 %v694_v14  ;;  %2314 = vmatprep.subr.bf16.mxu1 %v694_v14 }
 0x12a   : > { %2174 = vmatpush3.bf16.msra.mxu0 %v694_v14  ;;  %2322 = vmatpush3.bf16.msra.mxu1 %v694_v14 }
 0x12b   : > { %2175 = vmatprep.subr.bf16.mxu0 %v695_v15  ;;  %2315 = vmatprep.subr.bf16.mxu1 %v695_v15 }
 0x12e   : > { %2176 = vmatpush3.bf16.msra.mxu0 %v695_v15  ;;  %2323 = vmatpush3.bf16.msra.mxu1 %v695_v15 }
 0x12f   : > { %2177 = vmatprep.subr.bf16.mxu0 %v696_v16  ;;  %2316 = vmatprep.subr.bf16.mxu1 %v696_v16 }
 0x132   : > { %2178 = vmatpush3.bf16.msra.mxu0 %v696_v16  ;;  %2324 = vmatpush3.bf16.msra.mxu1 %v696_v16 }
 0x133   : > { %2179 = vmatprep.subr.bf16.mxu0 %v697_v17  ;;  %2317 = vmatprep.subr.bf16.mxu1 %v697_v17 }
 0x136   : > { %2180 = vmatpush3.bf16.msra.mxu0 %v697_v17  ;;  %2325 = vmatpush3.bf16.msra.mxu1 %v697_v17 }
 0x137   : > { %2181 = vmatprep.subr.bf16.mxu0 %v698_v18  ;;  %2318 = vmatprep.subr.bf16.mxu1 %v698_v18 }
 0x13a   : > { %2182 = vmatpush3.bf16.msra.mxu0 %v698_v18  ;;  %2326 = vmatpush3.bf16.msra.mxu1 %v698_v18 }
 0x13d   : > { %2184 = vmatmul.mubr.bf16.vlgmr.msra.gmra.mrb[0].mxu0 %v2418_v19  ;;  %2192 = vmatmul.mubr.bf16.vlgmr.msra.gmra.mrb[0].mxu1 %v2419_v20 }
 0x13e   : > { %2187 = vmatprep.mubr.bf16.mxu0 %v2420_v21  ;;  %2195 = vmatprep.mubr.bf16.mxu1 %v2421_v22 }
 0x145   : > { %2188 = vmatmul.mubr.bf16.gmra.mrb[4].mxu0 %v2422_v23  ;;  %2196 = vmatmul.mubr.bf16.gmra.mrb[4].mxu1 %v2423_v24 }
 0x210   : > { %v2185_v29 = vpop.f32.mrb[0].mxu0  ;;  %v2193_v30 = vpop.f32.mrb[0].mxu1 }
 0x211   : > { %v846_v33 = vadd.f32 %v2185_v29, %v657_v25  ;;  %v854_v34 = vadd.f32 %v2193_v30, %v665_v26  ;;  %v781_v35 = vpop.f32.mrb[1].mxu0  ;;  %v813_v36 = vpop.f32.mrb[1].mxu1 }
 0x212   : > { %v844_v39 = vadd.f32 %v781_v35, %v655_v27  ;;  %v852_v40 = vadd.f32 %v813_v36, %v663_v28  ;;  %v2186_v41 = vpop.f32.mrb[2].mxu0  ;;  %v2194_v42 = vpop.f32.mrb[2].mxu1 }
 0x213   : > { %862 = vst [vmem:[#allocation2 + $0x10] sm:$0xff] %v846_v33  ;;  %870 = vst [vmem:[#allocation2 + $0x50] sm:$0xff] %v854_v34  ;;  %v847_v43 = vadd.f32 %v2186_v41, %v658_v31  ;;  %v855_v44 = vadd.f32 %v2194_v42, %v666_v32  ;;  %v784_v45 = vpop.f32.mrb[3].mxu0  ;;  %v816_v46 = vpop.f32.mrb[3].mxu1 }
 0x214   : > { %860 = vst [vmem:[#allocation2] sm:$0xff] %v844_v39  ;;  %868 = vst [vmem:[#allocation2 + $0x40] sm:$0xff] %v852_v40  ;;  %v845_v47 = vadd.f32 %v784_v45, %v656_v37  ;;  %v853_v48 = vadd.f32 %v816_v46, %v664_v38 }
 0x215   : > { %863 = vst [vmem:[#allocation2 + $0x18] sm:$0xff] %v847_v43  ;;  %871 = vst [vmem:[#allocation2 + $0x58] sm:$0xff] %v855_v44 }
 0x216   : > { %861 = vst [vmem:[#allocation2 + $0x8] sm:$0xff] %v845_v47  ;;  %869 = vst [vmem:[#allocation2 + $0x48] sm:$0xff] %v853_v48 }
 0x218   : > { %v2189_v53 = vpop.f32.mrb[4].mxu0  ;;  %v2197_v54 = vpop.f32.mrb[4].mxu1 }
 0x219   : > { %v850_v57 = vadd.f32 %v2189_v53, %v661_v49  ;;  %v858_v58 = vadd.f32 %v2197_v54, %v669_v50  ;;  %v797_v59 = vpop.f32.mrb[5].mxu0  ;;  %v829_v60 = vpop.f32.mrb[5].mxu1 }
 0x21a   : > { %v848_v63 = vadd.f32 %v797_v59, %v659_v51  ;;  %v856_v0 = vadd.f32 %v829_v60, %v667_v52  ;;  %v2190_v1 = vpop.f32.mrb[6].mxu0  ;;  %v2198_v2 = vpop.f32.mrb[6].mxu1 }
 0x21b   : > { %866 = vst [vmem:[#allocation2 + $0x30] sm:$0xff] %v850_v57  ;;  %874 = vst [vmem:[#allocation2 + $0x70] sm:$0xff] %v858_v58  ;;  %v851_v3 = vadd.f32 %v2190_v1, %v662_v55  ;;  %v859_v4 = vadd.f32 %v2198_v2, %v670_v56  ;;  %v800_v5 = vpop.f32.mrb[7].mxu0  ;;  %v832_v6 = vpop.f32.mrb[7].mxu1 }
 0x21c   : > { %864 = vst [vmem:[#allocation2 + $0x20] sm:$0xff] %v848_v63  ;;  %872 = vst [vmem:[#allocation2 + $0x60] sm:$0xff] %v856_v0  ;;  %v849_v7 = vadd.f32 %v800_v5, %v660_v61  ;;  %v857_v8 = vadd.f32 %v832_v6, %v668_v62 }
 0x21d   : > { %867 = vst [vmem:[#allocation2 + $0x38] sm:$0xff] %v851_v3  ;;  %875 = vst [vmem:[#allocation2 + $0x78] sm:$0xff] %v859_v4 }
 0x21e   : > { %865 = vst [vmem:[#allocation2 + $0x28] sm:$0xff] %v849_v7  ;;  %873 = vst [vmem:[#allocation2 + $0x68] sm:$0xff] %v857_v8 }
 0x21f PF: > { %v2424_v9 = vld [vmem:[%s2529_s6] sm:$0xff]   ;;  %v2425_v10 = vld [vmem:[%s2529_s6 + $0x8] sm:$0xff]   ;;  %v2426_v11 = vld [vmem:[%s2529_s6 + $0x10] sm:$0xff]  }
 0x220   : > { %2199 = vmatprep.subr.bf16.mxu0 %v2424_v9  ;;  %2327 = vmatprep.subr.bf16.mxu1 %v2424_v9  ;;  %v2427_v12 = vld [vmem:[%s2529_s6 + $0x18] sm:$0xff]   ;;  %v880_v13 = vld [vmem:[#allocation2] sm:$0xff]  ;;  %v881_v14 = vld [vmem:[#allocation2 + $0x8] sm:$0xff] }
 0x221   : > { %2200 = vmatpush3.bf16.msra.mxu0 %v2424_v9  ;;  %2335 = vmatpush3.bf16.msra.mxu1 %v2424_v9  ;;  %v888_v15 = vld [vmem:[#allocation2 + $0x40] sm:$0xff]  ;;  %v896_v16 = vpack.c.bf16 %v881_v14, %v880_v13  ;;  %v889_v17 = vld [vmem:[#allocation2 + $0x48] sm:$0xff]  ;;  %v2430_v21 = vld [vmem:[%s2529_s6 + $0x30] sm:$0xff]  }
 0x222   : > { %2201 = vmatprep.subr.bf16.mxu0 %v2425_v10  ;;  %2328 = vmatprep.subr.bf16.mxu1 %v2425_v10  ;;  %v900_v18 = vpack.c.bf16 %v889_v17, %v888_v15  ;;  %v2428_v19 = vld [vmem:[%s2529_s6 + $0x20] sm:$0xff]   ;;  %v2429_v20 = vld [vmem:[%s2529_s6 + $0x28] sm:$0xff]   ;;  %v2431_v22 = vld [vmem:[%s2529_s6 + $0x38] sm:$0xff]  }
 0x223   : > { %2215 = vmatprep.mubr.bf16.mxu0 %v896_v16  ;;  %v882_v23 = vld [vmem:[#allocation2 + $0x10] sm:$0xff]  ;;  %v883_v24 = vld [vmem:[#allocation2 + $0x18] sm:$0xff]  ;;  %v884_v27 = vld [vmem:[#allocation2 + $0x20] sm:$0xff] }
 0x224   : > { %2223 = vmatprep.mubr.bf16.mxu1 %v900_v18  ;;  %v890_v25 = vld [vmem:[#allocation2 + $0x50] sm:$0xff]  ;;  %v891_v26 = vld [vmem:[#allocation2 + $0x58] sm:$0xff]  ;;  %v892_v29 = vld [vmem:[#allocation2 + $0x60] sm:$0xff]  ;;  %v897_v31 = vpack.c.bf16 %v883_v24, %v882_v23 }
 0x225   : > { %2202 = vmatpush3.bf16.msra.mxu0 %v2425_v10  ;;  %2336 = vmatpush3.bf16.msra.mxu1 %v2425_v10  ;;  %v885_v28 = vld [vmem:[#allocation2 + $0x28] sm:$0xff]  ;;  %v901_v32 = vpack.c.bf16 %v891_v26, %v890_v25  ;;  %v886_v35 = vld [vmem:[#allocation2 + $0x30] sm:$0xff]  ;;  %v887_v36 = vld [vmem:[#allocation2 + $0x38] sm:$0xff] }
 0x226   : > { %2203 = vmatprep.subr.bf16.mxu0 %v2426_v11  ;;  %2329 = vmatprep.subr.bf16.mxu1 %v2426_v11  ;;  %v893_v30 = vld [vmem:[#allocation2 + $0x68] sm:$0xff]  ;;  %v898_v33 = vpack.c.bf16 %v885_v28, %v884_v27  ;;  %v894_v37 = vld [vmem:[#allocation2 + $0x70] sm:$0xff]  ;;  %v895_v38 = vld [vmem:[#allocation2 + $0x78] sm:$0xff]  ;;  %v899_v39 = vpack.c.bf16 %v887_v36, %v886_v35 }
 0x227   : > { %v902_v34 = vpack.c.bf16 %v893_v30, %v892_v29  ;;  %v903_v40 = vpack.c.bf16 %v895_v38, %v894_v37  ;;  %v2432_v57 = vld [vmem:[%s2534_s9] sm:$0xff] (!%p1844_p8)   ;;  %v2433_v58 = vld [vmem:[%s2534_s9 + $0x8] sm:$0xff] (!%p1844_p8)   ;;  %v2434_v59 = vld [vmem:[%s2534_s9 + $0x10] sm:$0xff] (!%p1844_p8)  }
 0x228   : > { %v2435_v60 = vld [vmem:[%s2534_s9 + $0x18] sm:$0xff] (!%p1844_p8)   ;;  %v1072_v61 = vld [vmem:[#allocation3] sm:$0xff] (!%p1844_p8)  ;;  %v2437_v0 = vld [vmem:[%s2534_s9 + $0x28] sm:$0xff] (!%p1844_p8)  }
 0x229   : > { %2204 = vmatpush3.bf16.msra.mxu0 %v2426_v11  ;;  %2337 = vmatpush3.bf16.msra.mxu1 %v2426_v11  ;;  %v1076_v62 = vld [vmem:[#allocation3 + $0x20] sm:$0xff] (!%p1844_p8)  ;;  %v2438_v1 = vld [vmem:[%s2534_s9 + $0x30] sm:$0xff] (!%p1844_p8)   ;;  %v2439_v2 = vld [vmem:[%s2534_s9 + $0x38] sm:$0xff] (!%p1844_p8)  }
 0x22a   : > { %2205 = vmatprep.subr.bf16.mxu0 %v2427_v12  ;;  %2330 = vmatprep.subr.bf16.mxu1 %v2427_v12  ;;  %v2436_v63 = vld [vmem:[%s2534_s9 + $0x20] sm:$0xff] (!%p1844_p8)   ;;  %v1073_v3 = vld [vmem:[#allocation3 + $0x8] sm:$0xff] (!%p1844_p8)  ;;  %v1074_v5 = vld [vmem:[#allocation3 + $0x10] sm:$0xff] (!%p1844_p8) }
 0x22b   : > { %v1077_v4 = vld [vmem:[#allocation3 + $0x28] sm:$0xff] (!%p1844_p8)  ;;  %v1078_v6 = vld [vmem:[#allocation3 + $0x30] sm:$0xff] (!%p1844_p8)  ;;  %v1075_v7 = vld [vmem:[#allocation3 + $0x18] sm:$0xff] (!%p1844_p8) }
 0x22c   : > { %v1079_v8 = vld [vmem:[#allocation3 + $0x38] sm:$0xff] (!%p1844_p8)  ;;  %v2668_v10 = vld [vmem:[%s2524_s28] ss:$0 sm:$0xff] (!%p1844_p8) }
 0x22d   : > { %2206 = vmatpush3.bf16.msra.mxu0 %v2427_v12  ;;  %2338 = vmatpush3.bf16.msra.mxu1 %v2427_v12 }
 0x22e   : > { %2207 = vmatprep.subr.bf16.mxu0 %v2428_v19  ;;  %2331 = vmatprep.subr.bf16.mxu1 %v2428_v19 }
 0x231   : > { %2208 = vmatpush3.bf16.msra.mxu0 %v2428_v19  ;;  %2339 = vmatpush3.bf16.msra.mxu1 %v2428_v19 }
 0x232   : > { %2209 = vmatprep.subr.bf16.mxu0 %v2429_v20  ;;  %2332 = vmatprep.subr.bf16.mxu1 %v2429_v20 }
 0x235   : > { %2210 = vmatpush3.bf16.msra.mxu0 %v2429_v20  ;;  %2340 = vmatpush3.bf16.msra.mxu1 %v2429_v20 }
 0x236   : > { %2211 = vmatprep.subr.bf16.mxu0 %v2430_v21  ;;  %2333 = vmatprep.subr.bf16.mxu1 %v2430_v21 }
 0x239   : > { %2212 = vmatpush3.bf16.msra.mxu0 %v2430_v21  ;;  %2341 = vmatpush3.bf16.msra.mxu1 %v2430_v21 }
 0x23a   : > { %2213 = vmatprep.subr.bf16.mxu0 %v2431_v22  ;;  %2334 = vmatprep.subr.bf16.mxu1 %v2431_v22 }
 0x23d   : > { %2214 = vmatpush3.bf16.msra.mxu0 %v2431_v22  ;;  %2342 = vmatpush3.bf16.msra.mxu1 %v2431_v22 }
 0x23e   : > { %2231 = vmatprep.subr.bf16.mxu0 (!%p1844_p8), %v2432_v57  ;;  %2343 = vmatprep.subr.bf16.mxu1 (!%p1844_p8), %v2432_v57 }
 0x240   : > { %2216 = vmatmul.mubr.bf16.vlgmr.msra.gmra.mrb[0].mxu0 %v897_v31  ;;  %2224 = vmatmul.mubr.bf16.vlgmr.msra.gmra.mrb[0].mxu1 %v901_v32 }
 0x241   : > { %2219 = vmatprep.mubr.bf16.mxu0 %v898_v33  ;;  %2227 = vmatprep.mubr.bf16.mxu1 %v902_v34 }
 0x242   : > { %2232 = vmatpush3.bf16.msra.mxu0 (!%p1844_p8), %v2432_v57  ;;  %2351 = vmatpush3.bf16.msra.mxu1 (!%p1844_p8), %v2432_v57 }
 0x243   : > { %2233 = vmatprep.subr.bf16.mxu0 (!%p1844_p8), %v2433_v58  ;;  %2344 = vmatprep.subr.bf16.mxu1 (!%p1844_p8), %v2433_v58 }
 0x246   : > { %2234 = vmatpush3.bf16.msra.mxu0 (!%p1844_p8), %v2433_v58  ;;  %2352 = vmatpush3.bf16.msra.mxu1 (!%p1844_p8), %v2433_v58 }
 0x247   : > { %2235 = vmatprep.subr.bf16.mxu0 (!%p1844_p8), %v2434_v59  ;;  %2345 = vmatprep.subr.bf16.mxu1 (!%p1844_p8), %v2434_v59 }
 0x248   : > { %2220 = vmatmul.mubr.bf16.gmra.mrb[4].mxu0 %v899_v39  ;;  %2228 = vmatmul.mubr.bf16.gmra.mrb[4].mxu1 %v903_v40 }
 0x249   : > { %2247 = vmatprep.mubr.bf16.mxu0 (!%p1844_p8), %v1072_v61  ;;  %2255 = vmatprep.mubr.bf16.mxu1 (!%p1844_p8), %v1076_v62 }
 0x24a   : > { %2236 = vmatpush3.bf16.msra.mxu0 (!%p1844_p8), %v2434_v59  ;;  %2353 = vmatpush3.bf16.msra.mxu1 (!%p1844_p8), %v2434_v59 }
 0x24b   : > { %2237 = vmatprep.subr.bf16.mxu0 (!%p1844_p8), %v2435_v60  ;;  %2346 = vmatprep.subr.bf16.mxu1 (!%p1844_p8), %v2435_v60 }
 0x24e   : > { %2238 = vmatpush3.bf16.msra.mxu0 (!%p1844_p8), %v2435_v60  ;;  %2354 = vmatpush3.bf16.msra.mxu1 (!%p1844_p8), %v2435_v60 }
 0x24f   : > { %2239 = vmatprep.subr.bf16.mxu0 (!%p1844_p8), %v2436_v63  ;;  %2347 = vmatprep.subr.bf16.mxu1 (!%p1844_p8), %v2436_v63 }
 0x252   : > { %2240 = vmatpush3.bf16.msra.mxu0 (!%p1844_p8), %v2436_v63  ;;  %2355 = vmatpush3.bf16.msra.mxu1 (!%p1844_p8), %v2436_v63 }
 0x253   : > { %2241 = vmatprep.subr.bf16.mxu0 (!%p1844_p8), %v2437_v0  ;;  %2348 = vmatprep.subr.bf16.mxu1 (!%p1844_p8), %v2437_v0 }
 0x256   : > { %2242 = vmatpush3.bf16.msra.mxu0 (!%p1844_p8), %v2437_v0  ;;  %2356 = vmatpush3.bf16.msra.mxu1 (!%p1844_p8), %v2437_v0 }
 0x257   : > { %2243 = vmatprep.subr.bf16.mxu0 (!%p1844_p8), %v2438_v1  ;;  %2349 = vmatprep.subr.bf16.mxu1 (!%p1844_p8), %v2438_v1 }
 0x25a   : > { %2244 = vmatpush3.bf16.msra.mxu0 (!%p1844_p8), %v2438_v1  ;;  %2357 = vmatpush3.bf16.msra.mxu1 (!%p1844_p8), %v2438_v1 }
 0x25b   : > { %2245 = vmatprep.subr.bf16.mxu0 (!%p1844_p8), %v2439_v2  ;;  %2350 = vmatprep.subr.bf16.mxu1 (!%p1844_p8), %v2439_v2 }
 0x25e   : > { %2246 = vmatpush3.bf16.msra.mxu0 (!%p1844_p8), %v2439_v2  ;;  %2358 = vmatpush3.bf16.msra.mxu1 (!%p1844_p8), %v2439_v2 }
 0x313   : > { %v2625_v41 = vpop.f32.mrb[0].mxu0  ;;  %v2627_v42 = vpop.f32.mrb[0].mxu1 }
 0x314   : > { %v2629_v43 = vpop.f32.mrb[1].mxu0  ;;  %v2631_v44 = vpop.f32.mrb[1].mxu1 }
 0x315   : > { %v2633_v45 = vpop.f32.mrb[2].mxu0  ;;  %v2635_v46 = vpop.f32.mrb[2].mxu1 }
 0x316   : > { %v2637_v47 = vpop.f32.mrb[3].mxu0  ;;  %v2639_v48 = vpop.f32.mrb[3].mxu1  ;;  %2248 = vmatmul.mubr.bf16.vlgmr.msra.gmra.mrb[0].mxu0 (!%p1844_p8), %v1073_v3  ;;  %2256 = vmatmul.mubr.bf16.vlgmr.msra.gmra.mrb[0].mxu1 (!%p1844_p8), %v1077_v4 }
 0x317   : > { %2251 = vmatprep.mubr.bf16.mxu0 (!%p1844_p8), %v1074_v5  ;;  %2259 = vmatprep.mubr.bf16.mxu1 (!%p1844_p8), %v1078_v6 }
 0x318   : > { %1067 = sbr.rel (%p1844_p8) target bundleno = 1024 (0x400), region = 64 }
 0x31b   : > { %v2641_v49 = vpop.f32.mrb[4].mxu0  ;;  %v2643_v50 = vpop.f32.mrb[4].mxu1 }
 0x31c   : > { %v2645_v51 = vpop.f32.mrb[5].mxu0  ;;  %v2647_v52 = vpop.f32.mrb[5].mxu1 }
 0x31d   : > { %v2649_v53 = vpop.f32.mrb[6].mxu0  ;;  %v2651_v54 = vpop.f32.mrb[6].mxu1 }
 0x31e   : > { %v2653_v55 = vpop.f32.mrb[7].mxu0  ;;  %v2655_v56 = vpop.f32.mrb[7].mxu1  ;;  %2252 = vmatmul.mubr.bf16.gmra.mrb[4].mxu0 (!%p1844_p8), %v1075_v7  ;;  %2260 = vmatmul.mubr.bf16.gmra.mrb[4].mxu1 (!%p1844_p8), %v1079_v8 }
 0x3e9   : > { %v2249_v9 = vpop.f32.mrb[0].mxu0  ;;  %v2257_v11 = vpop.f32.mrb[0].mxu1 }
 0x3ea   : > { %v1243_v12 = vadd.f32 %v2249_v9, %v2625_v41  ;;  %v1251_v13 = vadd.f32 %v2257_v11, %v2627_v42  ;;  %v1178_v14 = vpop.f32.mrb[1].mxu0  ;;  %v1210_v15 = vpop.f32.mrb[1].mxu1 }
 0x3eb   : > { %v1241_v16 = vadd.f32 %v1178_v14, %v2629_v43  ;;  %v1249_v17 = vadd.f32 %v1210_v15, %v2631_v44  ;;  %v2250_v18 = vpop.f32.mrb[2].mxu0  ;;  %v2258_v19 = vpop.f32.mrb[2].mxu1 }
 0x3ec   : > { %v1266_v20 = vadd.f32 %v2668_v10, %v1243_v12  ;;  %v1274_v21 = vadd.f32 %v2668_v10, %v1251_v13  ;;  %v1244_v22 = vadd.f32 %v2250_v18, %v2633_v45  ;;  %v1252_v23 = vadd.f32 %v2258_v19, %v2635_v46  ;;  %v1181_v24 = vpop.f32.mrb[3].mxu0  ;;  %v1213_v25 = vpop.f32.mrb[3].mxu1 }
 0x3ed   : > { %v1264_v26 = vadd.f32 %v2668_v10, %v1241_v16  ;;  %v1272_v27 = vadd.f32 %v2668_v10, %v1249_v17  ;;  %v1242_v28 = vadd.f32 %v1181_v24, %v2637_v47  ;;  %v1250_v29 = vadd.f32 %v1213_v25, %v2639_v48 }
 0x3ee   : > { %v1267_v30 = vadd.f32 %v2668_v10, %v1244_v22  ;;  %v1275_v31 = vadd.f32 %v2668_v10, %v1252_v23  ;;  %v1282_v34 = vmax.f32 %v1266_v20, 0.0  ;;  %v1290_v35 = vmax.f32 %v1274_v21, 0.0 }
 0x3ef   : > { %v1265_v32 = vadd.f32 %v2668_v10, %v1242_v28  ;;  %v1273_v33 = vadd.f32 %v2668_v10, %v1250_v29  ;;  %v1280_v38 = vmax.f32 %v1264_v26, 0.0  ;;  %v1288_v39 = vmax.f32 %v1272_v27, 0.0 }
 0x3f0   : > { %v1283_v36 = vmax.f32 %v1267_v30, 0.0  ;;  %v1291_v37 = vmax.f32 %v1275_v31, 0.0 }
 0x3f1   : > { %v1281_v40 = vmax.f32 %v1265_v32, 0.0  ;;  %v1289_v57 = vmax.f32 %v1273_v33, 0.0  ;;  %v2253_v58 = vpop.f32.mrb[4].mxu0  ;;  %v2261_v59 = vpop.f32.mrb[4].mxu1 }
 0x3f2   : > { %v1297_v60 = vpack.c.bf16 %v1283_v36, %v1282_v34  ;;  %v1301_v61 = vpack.c.bf16 %v1291_v37, %v1290_v35  ;;  %v1247_v62 = vadd.f32 %v2253_v58, %v2641_v49  ;;  %v1255_v63 = vadd.f32 %v2261_v59, %v2643_v50  ;;  %v1194_v0 = vpop.f32.mrb[5].mxu0  ;;  %v1226_v1 = vpop.f32.mrb[5].mxu1 }
 0x3f3   : > { %v1296_v2 = vpack.c.bf16 %v1281_v40, %v1280_v38  ;;  %v1300_v3 = vpack.c.bf16 %v1289_v57, %v1288_v39  ;;  %v1245_v4 = vadd.f32 %v1194_v0, %v2645_v51  ;;  %v1253_v5 = vadd.f32 %v1226_v1, %v2647_v52  ;;  %v2254_v6 = vpop.f32.mrb[6].mxu0  ;;  %v2262_v7 = vpop.f32.mrb[6].mxu1 }
 0x3f4   : > { %1307 = vst [vmem:[#allocation4 + $0x8] sm:$0xff] %v1297_v60  ;;  %2041 = vst [vmem:[%s2809_s5 + $0x8] sm:$0xff] %v1297_v60   ;;  %v1270_v8 = vadd.f32 %v2668_v10, %v1247_v62  ;;  %v1278_v9 = vadd.f32 %v2668_v10, %v1255_v63  ;;  %v1248_v11 = vadd.f32 %v2254_v6, %v2649_v53  ;;  %v1197_v13 = vpop.f32.mrb[7].mxu0  ;;  %v1229_v14 = vpop.f32.mrb[7].mxu1 }
 0x3f5   : > { %1311 = vst [vmem:[#allocation4 + $0x28] sm:$0xff] %v1301_v61  ;;  %2045 = vst [vmem:[%s2809_s5 + $0x28] sm:$0xff] %v1301_v61   ;;  %v1256_v12 = vadd.f32 %v2262_v7, %v2651_v54  ;;  %v1268_v15 = vadd.f32 %v2668_v10, %v1245_v4  ;;  %v1276_v16 = vadd.f32 %v2668_v10, %v1253_v5 }
 0x3f6   : > { %1306 = vst [vmem:[#allocation4] sm:$0xff] %v1296_v2  ;;  %1965 = vst [vmem:[%s2809_s5] sm:$0xff] %v1296_v2   ;;  %v1246_v17 = vadd.f32 %v1197_v13, %v2653_v55  ;;  %v1254_v18 = vadd.f32 %v1229_v14, %v2655_v56  ;;  %v1271_v19 = vadd.f32 %v2668_v10, %v1248_v11  ;;  %v1286_v23 = vmax.f32 %v1270_v8, 0.0 }
 0x3f7   : > { %1310 = vst [vmem:[#allocation4 + $0x20] sm:$0xff] %v1300_v3  ;;  %2044 = vst [vmem:[%s2809_s5 + $0x20] sm:$0xff] %v1300_v3   ;;  %v1279_v20 = vadd.f32 %v2668_v10, %v1256_v12  ;;  %v1294_v24 = vmax.f32 %v1278_v9, 0.0  ;;  %v1284_v27 = vmax.f32 %v1268_v15, 0.0  ;;  %v1292_v28 = vmax.f32 %v1276_v16, 0.0 }
 0x3f8   : > { %v1269_v21 = vadd.f32 %v2668_v10, %v1246_v17  ;;  %v1277_v22 = vadd.f32 %v2668_v10, %v1254_v18  ;;  %v1287_v25 = vmax.f32 %v1271_v19, 0.0 }
 0x3f9   : > { %v1295_v26 = vmax.f32 %v1279_v20, 0.0 }
 0x3fa   : > { %v1285_v29 = vmax.f32 %v1269_v21, 0.0  ;;  %v1293_v30 = vmax.f32 %v1277_v22, 0.0  ;;  %v1299_v31 = vpack.c.bf16 %v1287_v25, %v1286_v23 }
 0x3fb   : > { %v1303_v32 = vpack.c.bf16 %v1295_v26, %v1294_v24 }
 0x3fc   : > { %v1298_v33 = vpack.c.bf16 %v1285_v29, %v1284_v27  ;;  %v1302_v34 = vpack.c.bf16 %v1293_v30, %v1292_v28  ;;  %1309 = vst [vmem:[#allocation4 + $0x18] sm:$0xff] %v1299_v31  ;;  %2043 = vst [vmem:[%s2809_s5 + $0x18] sm:$0xff] %v1299_v31  }
 0x3fd   : > { %1313 = vst [vmem:[#allocation4 + $0x38] sm:$0xff] %v1303_v32  ;;  %2047 = vst [vmem:[%s2809_s5 + $0x38] sm:$0xff] %v1303_v32  }
 0x3fe   : > { %1308 = vst [vmem:[#allocation4 + $0x10] sm:$0xff] %v1298_v33  ;;  %2042 = vst [vmem:[%s2809_s5 + $0x10] sm:$0xff] %v1298_v33  }
 0x3ff   : > { %1312 = vst [vmem:[#allocation4 + $0x30] sm:$0xff] %v1302_v34  ;;  %2046 = vst [vmem:[%s2809_s5 + $0x30] sm:$0xff] %v1302_v34  }
 0x400 PF: > { %1388 = sbr.rel (%p1853_p9) target bundleno = 1291 (0x50b), region = 68  ;;  %v2440_v10 = vld [vmem:[%s2534_s9] sm:$0xff] (!%p1853_p9)   ;;  %v2441_v35 = vld [vmem:[%s2534_s9 + $0x8] sm:$0xff] (!%p1853_p9)   ;;  %v2442_v36 = vld [vmem:[%s2534_s9 + $0x10] sm:$0xff] (!%p1853_p9)  }
 0x401   : > { %2263 = vmatprep.subr.bf16.mxu0 (!%p1853_p9), %v2440_v10  ;;  %2359 = vmatprep.subr.bf16.mxu1 (!%p1853_p9), %v2440_v10  ;;  %v2443_v37 = vld [vmem:[%s2534_s9 + $0x18] sm:$0xff] (!%p1853_p9)   ;;  %v1393_v38 = vld [vmem:[#allocation4] sm:$0xff] (!%p1853_p9)  ;;  %v2445_v57 = vld [vmem:[%s2534_s9 + $0x28] sm:$0xff] (!%p1853_p9)  }
 0x402   : > { %2264 = vmatpush3.bf16.msra.mxu0 (!%p1853_p9), %v2440_v10  ;;  %2367 = vmatpush3.bf16.msra.mxu1 (!%p1853_p9), %v2440_v10  ;;  %v1397_v39 = vld [vmem:[#allocation4 + $0x20] sm:$0xff] (!%p1853_p9)  ;;  %v2446_v58 = vld [vmem:[%s2534_s9 + $0x30] sm:$0xff] (!%p1853_p9)   ;;  %v2447_v59 = vld [vmem:[%s2534_s9 + $0x38] sm:$0xff] (!%p1853_p9)  }
 0x403   : > { %2265 = vmatprep.subr.bf16.mxu0 (!%p1853_p9), %v2441_v35  ;;  %2360 = vmatprep.subr.bf16.mxu1 (!%p1853_p9), %v2441_v35  ;;  %v2444_v40 = vld [vmem:[%s2534_s9 + $0x20] sm:$0xff] (!%p1853_p9)   ;;  %v1394_v60 = vld [vmem:[#allocation4 + $0x8] sm:$0xff] (!%p1853_p9)  ;;  %v1396_v0 = vld [vmem:[#allocation4 + $0x18] sm:$0xff] (!%p1853_p9) }
 0x404   : > { %2279 = vmatprep.mubr.bf16.mxu0 (!%p1853_p9), %v1393_v38  ;;  %2287 = vmatprep.mubr.bf16.mxu1 (!%p1853_p9), %v1397_v39  ;;  %v1398_v61 = vld [vmem:[#allocation4 + $0x28] sm:$0xff] (!%p1853_p9)  ;;  %v1400_v1 = vld [vmem:[#allocation4 + $0x38] sm:$0xff] (!%p1853_p9)  ;;  %v2737_v3 = vld [vmem:[%s2524_s28] ss:$0 sm:$0xff] (!%p1853_p9) }
 0x405   : > { %v1395_v62 = vld [vmem:[#allocation4 + $0x10] sm:$0xff] (!%p1853_p9) }
 0x406   : > { %2266 = vmatpush3.bf16.msra.mxu0 (!%p1853_p9), %v2441_v35  ;;  %2368 = vmatpush3.bf16.msra.mxu1 (!%p1853_p9), %v2441_v35  ;;  %v1399_v63 = vld [vmem:[#allocation4 + $0x30] sm:$0xff] (!%p1853_p9) }
 0x407   : > { %2267 = vmatprep.subr.bf16.mxu0 %v2442_v36  ;;  %2361 = vmatprep.subr.bf16.mxu1 %v2442_v36 }
 0x40a   : > { %2268 = vmatpush3.bf16.msra.mxu0 %v2442_v36  ;;  %2369 = vmatpush3.bf16.msra.mxu1 %v2442_v36 }
 0x40b   : > { %2269 = vmatprep.subr.bf16.mxu0 %v2443_v37  ;;  %2362 = vmatprep.subr.bf16.mxu1 %v2443_v37 }
 0x40e   : > { %2270 = vmatpush3.bf16.msra.mxu0 %v2443_v37  ;;  %2370 = vmatpush3.bf16.msra.mxu1 %v2443_v37 }
 0x40f   : > { %2271 = vmatprep.subr.bf16.mxu0 %v2444_v40  ;;  %2363 = vmatprep.subr.bf16.mxu1 %v2444_v40 }
 0x412   : > { %2272 = vmatpush3.bf16.msra.mxu0 %v2444_v40  ;;  %2371 = vmatpush3.bf16.msra.mxu1 %v2444_v40 }
 0x413   : > { %2273 = vmatprep.subr.bf16.mxu0 %v2445_v57  ;;  %2364 = vmatprep.subr.bf16.mxu1 %v2445_v57 }
 0x416   : > { %2274 = vmatpush3.bf16.msra.mxu0 %v2445_v57  ;;  %2372 = vmatpush3.bf16.msra.mxu1 %v2445_v57 }
 0x417   : > { %2275 = vmatprep.subr.bf16.mxu0 %v2446_v58  ;;  %2365 = vmatprep.subr.bf16.mxu1 %v2446_v58 }
 0x41a   : > { %2276 = vmatpush3.bf16.msra.mxu0 %v2446_v58  ;;  %2373 = vmatpush3.bf16.msra.mxu1 %v2446_v58 }
 0x41b   : > { %2277 = vmatprep.subr.bf16.mxu0 %v2447_v59  ;;  %2366 = vmatprep.subr.bf16.mxu1 %v2447_v59 }
 0x41e   : > { %2278 = vmatpush3.bf16.msra.mxu0 %v2447_v59  ;;  %2374 = vmatpush3.bf16.msra.mxu1 %v2447_v59 }
 0x421   : > { %2280 = vmatmul.mubr.bf16.vlgmr.msra.gmra.mrb[0].mxu0 %v1394_v60  ;;  %2288 = vmatmul.mubr.bf16.vlgmr.msra.gmra.mrb[0].mxu1 %v1398_v61 }
 0x422   : > { %2283 = vmatprep.mubr.bf16.mxu0 %v1395_v62  ;;  %2291 = vmatprep.mubr.bf16.mxu1 %v1399_v63 }
 0x429   : > { %2284 = vmatmul.mubr.bf16.gmra.mrb[4].mxu0 %v1396_v0  ;;  %2292 = vmatmul.mubr.bf16.gmra.mrb[4].mxu1 %v1400_v1 }
 0x4f4   : > { %v2281_v2 = vpop.f32.mrb[0].mxu0  ;;  %v2289_v4 = vpop.f32.mrb[0].mxu1 }
 0x4f5   : > { %v1564_v5 = vadd.f32 %v2281_v2, %v2625_v41  ;;  %v1572_v6 = vadd.f32 %v2289_v4, %v2627_v42  ;;  %v1499_v7 = vpop.f32.mrb[1].mxu0  ;;  %v1531_v8 = vpop.f32.mrb[1].mxu1 }
 0x4f6   : > { %v1562_v9 = vadd.f32 %v1499_v7, %v2629_v43  ;;  %v1570_v11 = vadd.f32 %v1531_v8, %v2631_v44  ;;  %v2282_v12 = vpop.f32.mrb[2].mxu0  ;;  %v2290_v13 = vpop.f32.mrb[2].mxu1 }
 0x4f7   : > { %v1587_v14 = vadd.f32 %v2737_v3, %v1564_v5  ;;  %v1595_v15 = vadd.f32 %v2737_v3, %v1572_v6  ;;  %v1565_v16 = vadd.f32 %v2282_v12, %v2633_v45  ;;  %v1573_v17 = vadd.f32 %v2290_v13, %v2635_v46  ;;  %v1502_v18 = vpop.f32.mrb[3].mxu0  ;;  %v1534_v41 = vpop.f32.mrb[3].mxu1 }
 0x4f8   : > { %v1585_v42 = vadd.f32 %v2737_v3, %v1562_v9  ;;  %v1593_v19 = vadd.f32 %v2737_v3, %v1570_v11  ;;  %v1563_v43 = vadd.f32 %v1502_v18, %v2637_v47  ;;  %v1571_v44 = vadd.f32 %v1534_v41, %v2639_v48 }
 0x4f9   : > { %v1588_v20 = vadd.f32 %v2737_v3, %v1565_v16  ;;  %v1596_v21 = vadd.f32 %v2737_v3, %v1573_v17  ;;  %v1603_v23 = vmax.f32 %v1587_v14, 0.0  ;;  %v1611_v46 = vmax.f32 %v1595_v15, 0.0 }
 0x4fa   : > { %v1586_v22 = vadd.f32 %v2737_v3, %v1563_v43  ;;  %v1594_v45 = vadd.f32 %v2737_v3, %v1571_v44  ;;  %v1601_v26 = vmax.f32 %v1585_v42, 0.0  ;;  %v1609_v27 = vmax.f32 %v1593_v19, 0.0 }
 0x4fb   : > { %v1604_v24 = vmax.f32 %v1588_v20, 0.0  ;;  %v1612_v25 = vmax.f32 %v1596_v21, 0.0 }
 0x4fc   : > { %v1602_v28 = vmax.f32 %v1586_v22, 0.0  ;;  %v1610_v29 = vmax.f32 %v1594_v45, 0.0  ;;  %v2285_v30 = vpop.f32.mrb[4].mxu0  ;;  %v2293_v47 = vpop.f32.mrb[4].mxu1 }
 0x4fd   : > { %v1618_v31 = vpack.c.bf16 %v1604_v24, %v1603_v23  ;;  %v1622_v48 = vpack.c.bf16 %v1612_v25, %v1611_v46  ;;  %v1568_v32 = vadd.f32 %v2285_v30, %v2641_v49  ;;  %v1576_v33 = vadd.f32 %v2293_v47, %v2643_v50  ;;  %v1515_v34 = vpop.f32.mrb[5].mxu0  ;;  %v1547_v10 = vpop.f32.mrb[5].mxu1 }
 0x4fe   : > { %v1617_v35 = vpack.c.bf16 %v1602_v28, %v1601_v26  ;;  %v1621_v36 = vpack.c.bf16 %v1610_v29, %v1609_v27  ;;  %v1566_v37 = vadd.f32 %v1515_v34, %v2645_v51  ;;  %v1574_v38 = vadd.f32 %v1547_v10, %v2647_v52  ;;  %v2286_v39 = vpop.f32.mrb[6].mxu0  ;;  %v2294_v40 = vpop.f32.mrb[6].mxu1 }
 0x4ff   : > { %1628 = vst [vmem:[#allocation3 + $0x8] sm:$0xff] %v1618_v31  ;;  %2048 = vst [vmem:[%s2809_s5 + $0x8] sm:$0xff] %v1618_v31   ;;  %v1591_v49 = vadd.f32 %v2737_v3, %v1568_v32  ;;  %v1599_v50 = vadd.f32 %v2737_v3, %v1576_v33  ;;  %v1569_v51 = vadd.f32 %v2286_v39, %v2649_v53  ;;  %v1518_v57 = vpop.f32.mrb[7].mxu0  ;;  %v1550_v58 = vpop.f32.mrb[7].mxu1 }
 0x500   : > { %1632 = vst [vmem:[#allocation3 + $0x28] sm:$0xff] %v1622_v48  ;;  %2052 = vst [vmem:[%s2809_s5 + $0x28] sm:$0xff] %v1622_v48   ;;  %v1577_v52 = vadd.f32 %v2294_v40, %v2651_v54  ;;  %v1589_v59 = vadd.f32 %v2737_v3, %v1566_v37  ;;  %v1597_v60 = vadd.f32 %v2737_v3, %v1574_v38 }
 0x501   : > { %1627 = vst [vmem:[#allocation3] sm:$0xff] %v1617_v35  ;;  %2005 = vst [vmem:[%s2809_s5] sm:$0xff] %v1617_v35   ;;  %v1567_v53 = vadd.f32 %v1518_v57, %v2653_v55  ;;  %v1575_v54 = vadd.f32 %v1550_v58, %v2655_v56  ;;  %v1592_v61 = vadd.f32 %v2737_v3, %v1569_v51  ;;  %v1607_v1 = vmax.f32 %v1591_v49, 0.0 }
 0x502   : > { %1631 = vst [vmem:[#allocation3 + $0x20] sm:$0xff] %v1621_v36  ;;  %2051 = vst [vmem:[%s2809_s5 + $0x20] sm:$0xff] %v1621_v36   ;;  %v1600_v62 = vadd.f32 %v2737_v3, %v1577_v52  ;;  %v1615_v2 = vmax.f32 %v1599_v50, 0.0  ;;  %v1605_v6 = vmax.f32 %v1589_v59, 0.0  ;;  %v1613_v7 = vmax.f32 %v1597_v60, 0.0 }
 0x503   : > { %v1590_v63 = vadd.f32 %v2737_v3, %v1567_v53  ;;  %v1598_v0 = vadd.f32 %v2737_v3, %v1575_v54  ;;  %v1608_v4 = vmax.f32 %v1592_v61, 0.0 }
 0x504   : > { %v1616_v5 = vmax.f32 %v1600_v62, 0.0 }
 0x505   : > { %v1606_v8 = vmax.f32 %v1590_v63, 0.0  ;;  %v1614_v9 = vmax.f32 %v1598_v0, 0.0  ;;  %v1620_v11 = vpack.c.bf16 %v1608_v4, %v1607_v1 }
 0x506   : > { %v1624_v55 = vpack.c.bf16 %v1616_v5, %v1615_v2 }
 0x507   : > { %v1619_v12 = vpack.c.bf16 %v1606_v8, %v1605_v6  ;;  %v1623_v56 = vpack.c.bf16 %v1614_v9, %v1613_v7  ;;  %1630 = vst [vmem:[#allocation3 + $0x18] sm:$0xff] %v1620_v11  ;;  %2050 = vst [vmem:[%s2809_s5 + $0x18] sm:$0xff] %v1620_v11  }
 0x508   : > { %1634 = vst [vmem:[#allocation3 + $0x38] sm:$0xff] %v1624_v55  ;;  %2054 = vst [vmem:[%s2809_s5 + $0x38] sm:$0xff] %v1624_v55  }
 0x509   : > { %1629 = vst [vmem:[#allocation3 + $0x10] sm:$0xff] %v1619_v12  ;;  %2049 = vst [vmem:[%s2809_s5 + $0x10] sm:$0xff] %v1619_v12  }
 0x50a   : > { %1633 = vst [vmem:[#allocation3 + $0x30] sm:$0xff] %v1623_v56  ;;  %2053 = vst [vmem:[%s2809_s5 + $0x30] sm:$0xff] %v1623_v56  }
 0x50b PF: > { %s15_s20 = sadd.s32 1, %s2470_s20   ;;  %s2810_s18 = smov %s2466_s19 }
 0x50c   : > { %p12_p10 = scmp.ge.s32.totalorder %s15_s20, 4   ;;  %s2811_s19 = smov %s2813_s21 }
 0x50e   :  { %14 = sbr.rel (!%p12_p10) target bundleno = 2 (0x2), region = 113 }

</bundles_post_ra>
